<compile_context>
chip_gen: v7x
topology: tpu7x:2x2x1
jax: 0.10.0
libtpu: 0.0.40
codegen_flags: <defaults>
</compile_context>

<pallas_src>
import functools

import jax
import jax.numpy as jnp
from jax.experimental import pallas as pl
from jax.experimental.pallas import tpu as pltpu


# ---------------------------------------------------------------------------
# Kernel
# ---------------------------------------------------------------------------
def _kvmn_kernel(h_ref, ek_ref, vm_ref, m_ref, vtab_ref, o_ref, *, inv_temper):
    # h_ref   : [1, TL, Hp]      hidden_state tile (activation dtype)
    # ek_ref  : [1, K,  Hp]      key embeddings (per batch, L-invariant)
    # vm_ref  : [1, TL, K] int32 value indices
    # m_ref   : [1, TL, K]       key mask (int or float, original semantics)
    # vtab_ref: [V, Hp]          value embedding table (grid-invariant, VMEM resident)
    h = h_ref[0]                                   # [TL, Hp]
    ek = ek_ref[0]                                 # [K, Hp]
    vm = vm_ref[0]                                 # [TL, K] int32
    m = m_ref[0]                                   # [TL, K]
    vtab = vtab_ref[...]                           # [V, Hp]

    TL, K = vm.shape
    V = vtab.shape[0]

    # u = (hidden / temper) @ emb_key^T  -> [TL, K]; fed in activation dtype,
    # f32 accumulation on the MXU.
    h_scaled = h * jnp.asarray(inv_temper, h.dtype)
    u = jax.lax.dot_general(
        h_scaled, ek,
        dimension_numbers=(((1,), (1,)), ((), ())),
        preferred_element_type=jnp.float32,
    )                                              # [TL, K] f32

    # clamp(mask, 0, 1): for integer masks this is exactly (m > 0); floats keep
    # the original clip semantics.
    if jnp.issubdtype(m.dtype, jnp.floating):
        mask = jnp.clip(m.astype(jnp.float32), 0.0, 1.0)
    else:
        mask = (m > 0).astype(jnp.float32)

    # Row-max subtraction for a stable exp; it cancels in the normalization
    # (difference vs. the reference is ~1e-10 relative via the epsilon).
    u_max = jnp.max(u, axis=1, keepdims=True)
    delta = jnp.exp(u - u_max) * mask              # [TL, K]
    denom = jnp.sum(delta, axis=1, keepdims=True) + 1e-10
    p = delta * (1.0 / denom)                      # [TL, K], exact reciprocal

    # Soft one-hot accumulation, one memory slot k at a time; the live set is
    # bounded to the [TL, V] accumulator plus one [TL, V] temporary (no
    # [TL, K, V] materialization).  K is a small static constant, so the
    # Python loop fully unrolls at trace time.
    # NOTE: out-of-range value indices contribute zero here (nn.Embedding
    # would raise); in-range behaviour is identical.
    lane_v = jax.lax.broadcasted_iota(jnp.int32, (1, V), 1)   # [1, V]
    A = jnp.zeros((TL, V), jnp.float32)
    for k in range(K):
        sel = vm[:, k:k + 1] == lane_v                         # [TL, V] bool
        A = A + jnp.where(sel, p[:, k:k + 1], 0.0)             # [TL, V] f32

    # o = A @ val_table on the MXU.  A holds probabilities in [0, 1], so the
    # cast to the table's (activation) dtype is a ~1e-3-relative perturbation
    # at worst for bf16 models and exact for f32 models.
    o = jnp.dot(A.astype(vtab.dtype), vtab,
                preferred_element_type=jnp.float32)            # [TL, Hp] f32

    # b_add=True: residual connection.
    o_ref[0] = (o + h.astype(jnp.float32)).astype(o_ref.dtype)


# ---------------------------------------------------------------------------
# Wrapper helpers
# ---------------------------------------------------------------------------
def _round_up(x, m):
    return ((x + m - 1) // m) * m


def _vmem_limit_bytes():
    """Generation-aware VMEM budget with headroom for compiler scratch."""
    cap = None
    try:
        cap = getattr(pltpu.get_tpu_info(), "vmem_capacity_bytes", None)
    except Exception:
        cap = None
    if not cap:
        cap = 64 * 1024 * 1024          # conservative: v7x has 64 MiB / TC
    # 25% headroom; ~48 MiB on v7x, ~96 MiB on v5e/v6e (128 MiB parts).
    return min(int(cap) * 3 // 4, 112 * 1024 * 1024)


def _choose_l_tile(L, Hp, K, V, elem_bytes, vmem_limit):
    """Largest L-tile (<=512, multiple of 8) whose per-step footprint fits."""
    budget = int(vmem_limit * 0.6)
    resident = (V + K) * Hp * elem_bytes            # single-buffered invariants
    l_cap = _round_up(max(L, 8), 8)
    for tl in (512, 256, 128, 64, 32, 16, 8):
        if tl > l_cap:
            continue
        streams = 2 * tl * Hp * elem_bytes * 2      # hidden in + out, double-buffered
        streams += 2 * tl * K * 4 * 2               # value idx + mask (i32), double-buffered
        live = tl * V * 4 + tl * Hp * 4 + 2 * tl * K * 4   # A, o(f32), u/p temporaries
        if resident + streams + live <= budget:
            return tl
    return 8


def _build_specs(TL, Hp, K, V, single_buffer_invariants):
    inv_kwargs = {}
    if single_buffer_invariants:
        # Grid-invariant inputs: one VMEM buffer is enough, halving their footprint.
        inv_kwargs = dict(pipeline_mode=pl.Buffered(1))
    in_specs = [
        pl.BlockSpec((1, TL, Hp), lambda b, l: (b, l, 0)),                  # hidden tile
        pl.BlockSpec((1, K, Hp), lambda b, l: (b, 0, 0), **inv_kwargs),     # emb_key (L-invariant)
        pl.BlockSpec((1, TL, K), lambda b, l: (b, l, 0)),                   # value indices
        pl.BlockSpec((1, TL, K), lambda b, l: (b, l, 0)),                   # key mask
        pl.BlockSpec((V, Hp), lambda b, l: (0, 0), **inv_kwargs),           # value table
    ]
    out_spec = pl.BlockSpec((1, TL, Hp), lambda b, l: (b, l, 0))
    return in_specs, out_spec


# ---------------------------------------------------------------------------
# Public forward
# ---------------------------------------------------------------------------
def kvmn_forward(hidden_state, key_seq, value_matrix, key_mask_matrix,
                 key_emb_table, val_emb_table):
    """hidden_state: [B, L, H]; key_seq: [B, K] int; value_matrix: [B, L, K] int;
    key_mask_matrix: [B, L, K]; key_emb_table: [key_size, H]; val_emb_table: [val_size, H]."""
    B, L, H = hidden_state.shape
    K = key_seq.shape[-1]
    V = val_emb_table.shape[0]
    inv_temper = 1.0 / (float(H) ** 0.5)
    act_dtype = hidden_state.dtype
    elem_bytes = jnp.dtype(act_dtype).itemsize

    # --- lane-dense hidden dim: pad H to a multiple of 128 (zero pad cancels
    # in the contraction and in the residual add; sliced off at the end).
    Hp = _round_up(H, 128)
    if Hp != H:
        hidden_p = jnp.pad(hidden_state, ((0, 0), (0, 0), (0, Hp - H)))
        key_tab_p = jnp.pad(key_emb_table, ((0, 0), (0, Hp - H)))
        val_tab_p = jnp.pad(val_emb_table, ((0, 0), (0, Hp - H)))
    else:
        hidden_p, key_tab_p, val_tab_p = hidden_state, key_emb_table, val_emb_table

    # Small per-batch key-embedding gather stays as JAX glue ([B, K, Hp]);
    # value table is passed pre-cast (hoisted) and resolved in-kernel.
    emb_key = jnp.take(key_tab_p, key_seq, axis=0).astype(act_dtype)
    vtab = val_tab_p.astype(act_dtype)

    vm = value_matrix.astype(jnp.int32)
    if jnp.issubdtype(key_mask_matrix.dtype, jnp.floating):
        mask_in = key_mask_matrix.astype(jnp.float32)
    else:
        mask_in = key_mask_matrix.astype(jnp.int32)
    # TODO(synk): when K >= 128, carry the mask as int8/bool and value_matrix as
    # int16 to shrink the two [B, L, K] HBM streams (sub-32-bit tiles are (32,128),
    # so narrowing only pays off for lane-aligned K).

    # --- VMEM-aware L tiling; pad L so every tile is full (padded rows have a
    # zero mask -> zero output and are sliced off).
    vmem_limit = _vmem_limit_bytes()
    TL = _choose_l_tile(L, Hp, K, V, elem_bytes, vmem_limit)
    Lp = _round_up(L, TL)
    if Lp != L:
        pad_l = Lp - L
        hidden_p = jnp.pad(hidden_p, ((0, 0), (0, pad_l), (0, 0)))
        vm = jnp.pad(vm, ((0, 0), (0, pad_l), (0, 0)))
        mask_in = jnp.pad(mask_in, ((0, 0), (0, pad_l), (0, 0)))

    grid = (B, Lp // TL)
    kernel = functools.partial(_kvmn_kernel, inv_temper=inv_temper)

    # TODO(synk): for very large value vocabularies (V*Hp table not VMEM-resident,
    # esp. on v7x's 64 MiB), add an inner V-tiled pipeline accumulating partial
    # A-slices and partial A_v @ vtab_v dots instead of keeping the table resident.

    last_err = None
    for single_buf in (True, False):   # fallback if pipeline_mode=Buffered(1) unsupported
        try:
            in_specs, out_spec = _build_specs(TL, Hp, K, V, single_buf)
            out = pl.pallas_call(
                kernel,
                out_shape=jax.ShapeDtypeStruct((B, Lp, Hp), act_dtype),
                grid_spec=pltpu.PrefetchScalarGridSpec(
                    num_scalar_prefetch=0,
                    grid=grid,
                    in_specs=in_specs,
                    out_specs=out_spec,
                ),
                compiler_params=pltpu.CompilerParams(
                    dimension_semantics=("parallel", "parallel"),
                    vmem_limit_bytes=vmem_limit,
                ),
            )(hidden_p, emb_key, vm, mask_in, vtab)
            return out[:, :L, :H]
        except Exception as e:  # compatibility fallback only
            last_err = e
    raise last_err


# ---------------------------------------------------------------------------
# Pure-JAX reference mirroring the PyTorch forward (default flags)
# ---------------------------------------------------------------------------
def kvmn_reference(hidden_state, key_seq, value_matrix, key_mask_matrix,
                   key_emb_table, val_emb_table):
    H = hidden_state.shape[-1]
    temper = float(H) ** 0.5
    emb_key = jnp.take(key_emb_table, key_seq, axis=0)       # [B, K, H]
    emb_val = jnp.take(val_emb_table, value_matrix, axis=0)  # [B, L, K, H]
    u = jnp.einsum("blh,bkh->blk", hidden_state.astype(jnp.float32),
                   emb_key.astype(jnp.float32)) / temper
    mask = jnp.clip(key_mask_matrix.astype(jnp.float32), 0.0, 1.0)
    d = jnp.exp(u) * mask
    s = jnp.sum(d, axis=2, keepdims=True)
    p = d / (s + 1e-10)
    o = jnp.sum(p[..., None] * emb_val.astype(jnp.float32), axis=2)
    return (o + hidden_state).astype(hidden_state.dtype)


if __name__ == "__main__":
    # Small deterministic example.
    B, L, K, H = 2, 8, 8, 32
    key_size, val_size = 16, 16

    root = jax.random.PRNGKey(0)
    k1, k2, k3, k4, k5, k6 = jax.random.split(root, 6)

    hidden_state = jax.random.normal(k1, (B, L, H), dtype=jnp.float32)
    key_seq = jax.random.randint(k2, (B, K), 0, key_size, dtype=jnp.int32)
    value_matrix = jax.random.randint(k3, (B, L, K), 0, val_size, dtype=jnp.int32)
    key_mask_matrix = jax.random.randint(k4, (B, L, K), 0, 2, dtype=jnp.int32)

    key_emb_table = jax.random.normal(k5, (key_size, H), dtype=jnp.float32)
    val_emb_table = jax.random.normal(k6, (val_size, H), dtype=jnp.float32)

    out = kvmn_forward(hidden_state, key_seq, value_matrix, key_mask_matrix,
                       key_emb_table, val_emb_table)
    out = jax.block_until_ready(out)

    ref = kvmn_reference(hidden_state, key_seq, value_matrix, key_mask_matrix,
                         key_emb_table, val_emb_table)
    assert out.shape == (B, L, H)
    assert jnp.allclose(out, ref, atol=5e-4, rtol=5e-4), "mismatch vs reference"

    print("KERNEL_OK")
</pallas_src>

<mosaic_0001>
module attributes {stable_mosaic.version = 11 : i64} {
  func.func @_kvmn_kernel(%arg0: i32, %arg1: i32, %arg2: memref<1x8x128xf32, #tpu.memory_space<vmem>>, %arg3: memref<1x8x128xf32, #tpu.memory_space<vmem>>, %arg4: memref<1x8x8xi32, #tpu.memory_space<vmem>>, %arg5: memref<1x8x8xi32, #tpu.memory_space<vmem>>, %arg6: memref<16x128xf32, #tpu.memory_space<vmem>>, %arg7: memref<1x8x128xf32, #tpu.memory_space<vmem>>) attributes {dimension_semantics = [#tpu.dimension_semantics<parallel>, #tpu.dimension_semantics<parallel>], iteration_bounds = array<i64: 2, 1>, scalar_prefetch = 0 : i64, scratch_operands = 0 : i64, tpu.core_type = #tpu.core_type<tc>, window_params = [{transform_indices = @transform_0, window_bounds = array<i64: 1, 8, 128>}, {pipeline_mode = #tpu.pipeline_mode<synchronous>, transform_indices = @transform_1, window_bounds = array<i64: 1, 8, 128>}, {transform_indices = @transform_2, window_bounds = array<i64: 1, 8, 8>}, {transform_indices = @transform_3, window_bounds = array<i64: 1, 8, 8>}, {pipeline_mode = #tpu.pipeline_mode<synchronous>, transform_indices = @transform_4, window_bounds = array<i64: 16, 128>}, {transform_indices = @transform_5, window_bounds = array<i64: 1, 8, 128>}]} {
    %c0 = arith.constant 0 : index
    %c0_0 = arith.constant 0 : index
    %c0_1 = arith.constant 0 : index
    %0 = vector.load %arg2[%c0, %c0_0, %c0_1] : memref<1x8x128xf32, #tpu.memory_space<vmem>>, vector<1x8x128xf32>
    %1 = vector.shape_cast %0 : vector<1x8x128xf32> to vector<8x128xf32>
    %c0_2 = arith.constant 0 : index
    %c0_3 = arith.constant 0 : index
    %c0_4 = arith.constant 0 : index
    %2 = vector.load %arg3[%c0_2, %c0_3, %c0_4] : memref<1x8x128xf32, #tpu.memory_space<vmem>>, vector<1x8x128xf32>
    %3 = vector.shape_cast %2 : vector<1x8x128xf32> to vector<8x128xf32>
    %c0_5 = arith.constant 0 : index
    %c0_6 = arith.constant 0 : index
    %c0_7 = arith.constant 0 : index
    %4 = vector.load %arg4[%c0_5, %c0_6, %c0_7] : memref<1x8x8xi32, #tpu.memory_space<vmem>>, vector<1x8x8xi32>
    %5 = vector.shape_cast %4 : vector<1x8x8xi32> to vector<8x8xi32>
    %c0_8 = arith.constant 0 : index
    %c0_9 = arith.constant 0 : index
    %c0_10 = arith.constant 0 : index
    %6 = vector.load %arg5[%c0_8, %c0_9, %c0_10] : memref<1x8x8xi32, #tpu.memory_space<vmem>>, vector<1x8x8xi32>
    %7 = vector.shape_cast %6 : vector<1x8x8xi32> to vector<8x8xi32>
    %c0_11 = arith.constant 0 : index
    %c0_12 = arith.constant 0 : index
    %8 = vector.load %arg6[%c0_11, %c0_12] : memref<16x128xf32, #tpu.memory_space<vmem>>, vector<16x128xf32>
    %cst = arith.constant 0.176776692 : f32
    %9 = vector.broadcast %cst : f32 to vector<8x128xf32>
    %10 = arith.mulf %1, %9 : vector<8x128xf32>
    %cst_13 = arith.constant dense<0.000000e+00> : vector<8x8xf32>
    %11 = tpu.matmul %10, %3, %cst_13 {dimension_numbers = #tpu.dot_dimension_numbers<[1], [1], [0], [0], [0, 0, 1, 0], [], []>} : vector<8x128xf32>, vector<8x128xf32>, vector<8x8xf32> -> vector<8x8xf32>
    %c0_i32 = arith.constant 0 : i32
    %12 = vector.broadcast %c0_i32 : i32 to vector<8x8xi32>
    %13 = arith.cmpi sgt, %7, %12 : vector<8x8xi32>
    %14 = arith.extui %13 : vector<8x8xi1> to vector<8x8xi32>
    %15 = arith.sitofp %14 : vector<8x8xi32> to vector<8x8xf32>
    %cst_14 = arith.constant dense<0xFF800000> : vector<8xf32>
    %16 = vector.multi_reduction <maximumf>, %11, %cst_14 [1] : vector<8x8xf32> to vector<8xf32>
    %17 = vector.shape_cast %16 : vector<8xf32> to vector<8x1xf32>
    %18 = vector.broadcast %17 : vector<8x1xf32> to vector<8x8xf32>
    %19 = arith.subf %11, %18 : vector<8x8xf32>
    %20 = math.exp %19 : vector<8x8xf32>
    %21 = arith.mulf %20, %15 : vector<8x8xf32>
    %cst_15 = arith.constant dense<0.000000e+00> : vector<8xf32>
    %22 = vector.multi_reduction <add>, %21, %cst_15 [1] : vector<8x8xf32> to vector<8xf32>
    %23 = vector.shape_cast %22 : vector<8xf32> to vector<8x1xf32>
    %cst_16 = arith.constant 1.000000e-10 : f32
    %24 = vector.broadcast %cst_16 : f32 to vector<8x1xf32>
    %25 = arith.addf %23, %24 : vector<8x1xf32>
    %cst_17 = arith.constant 1.000000e+00 : f32
    %26 = vector.broadcast %cst_17 : f32 to vector<8x1xf32>
    %27 = arith.divf %26, %25 : vector<8x1xf32>
    %28 = vector.broadcast %27 : vector<8x1xf32> to vector<8x8xf32>
    %29 = arith.mulf %21, %28 : vector<8x8xf32>
    %30 = tpu.iota {dimensions = array<i32: 1>} : vector<1x16xi32>
    %cst_18 = arith.constant 0.000000e+00 : f32
    %31 = vector.broadcast %cst_18 : f32 to vector<8x16xf32>
    %32 = vector.extract_strided_slice %5 {offsets = [0, 0], sizes = [8, 1], strides = [1, 1]} : vector<8x8xi32> to vector<8x1xi32>
    %33 = vector.broadcast %32 : vector<8x1xi32> to vector<8x16xi32>
    %34 = vector.broadcast %30 : vector<1x16xi32> to vector<8x16xi32>
    %35 = arith.cmpi eq, %33, %34 : vector<8x16xi32>
    %36 = vector.extract_strided_slice %29 {offsets = [0, 0], sizes = [8, 1], strides = [1, 1]} : vector<8x8xf32> to vector<8x1xf32>
    %cst_19 = arith.constant 0.000000e+00 : f32
    %37 = vector.shape_cast %36 : vector<8x1xf32> to vector<8x1xf32>
    %38 = vector.broadcast %37 : vector<8x1xf32> to vector<8x16xf32>
    %39 = vector.broadcast %cst_19 : f32 to vector<8x16xf32>
    %40 = arith.select %35, %38, %39 : vector<8x16xi1>, vector<8x16xf32>
    %41 = arith.addf %31, %40 : vector<8x16xf32>
    %42 = vector.extract_strided_slice %5 {offsets = [0, 1], sizes = [8, 1], strides = [1, 1]} : vector<8x8xi32> to vector<8x1xi32>
    %43 = vector.broadcast %42 : vector<8x1xi32> to vector<8x16xi32>
    %44 = vector.broadcast %30 : vector<1x16xi32> to vector<8x16xi32>
    %45 = arith.cmpi eq, %43, %44 : vector<8x16xi32>
    %46 = vector.extract_strided_slice %29 {offsets = [0, 1], sizes = [8, 1], strides = [1, 1]} : vector<8x8xf32> to vector<8x1xf32>
    %cst_20 = arith.constant 0.000000e+00 : f32
    %47 = vector.shape_cast %46 : vector<8x1xf32> to vector<8x1xf32>
    %48 = vector.broadcast %47 : vector<8x1xf32> to vector<8x16xf32>
    %49 = vector.broadcast %cst_20 : f32 to vector<8x16xf32>
    %50 = arith.select %45, %48, %49 : vector<8x16xi1>, vector<8x16xf32>
    %51 = arith.addf %41, %50 : vector<8x16xf32>
    %52 = vector.extract_strided_slice %5 {offsets = [0, 2], sizes = [8, 1], strides = [1, 1]} : vector<8x8xi32> to vector<8x1xi32>
    %53 = vector.broadcast %52 : vector<8x1xi32> to vector<8x16xi32>
    %54 = vector.broadcast %30 : vector<1x16xi32> to vector<8x16xi32>
    %55 = arith.cmpi eq, %53, %54 : vector<8x16xi32>
    %56 = vector.extract_strided_slice %29 {offsets = [0, 2], sizes = [8, 1], strides = [1, 1]} : vector<8x8xf32> to vector<8x1xf32>
    %cst_21 = arith.constant 0.000000e+00 : f32
    %57 = vector.shape_cast %56 : vector<8x1xf32> to vector<8x1xf32>
    %58 = vector.broadcast %57 : vector<8x1xf32> to vector<8x16xf32>
    %59 = vector.broadcast %cst_21 : f32 to vector<8x16xf32>
    %60 = arith.select %55, %58, %59 : vector<8x16xi1>, vector<8x16xf32>
    %61 = arith.addf %51, %60 : vector<8x16xf32>
    %62 = vector.extract_strided_slice %5 {offsets = [0, 3], sizes = [8, 1], strides = [1, 1]} : vector<8x8xi32> to vector<8x1xi32>
    %63 = vector.broadcast %62 : vector<8x1xi32> to vector<8x16xi32>
    %64 = vector.broadcast %30 : vector<1x16xi32> to vector<8x16xi32>
    %65 = arith.cmpi eq, %63, %64 : vector<8x16xi32>
    %66 = vector.extract_strided_slice %29 {offsets = [0, 3], sizes = [8, 1], strides = [1, 1]} : vector<8x8xf32> to vector<8x1xf32>
    %cst_22 = arith.constant 0.000000e+00 : f32
    %67 = vector.shape_cast %66 : vector<8x1xf32> to vector<8x1xf32>
    %68 = vector.broadcast %67 : vector<8x1xf32> to vector<8x16xf32>
    %69 = vector.broadcast %cst_22 : f32 to vector<8x16xf32>
    %70 = arith.select %65, %68, %69 : vector<8x16xi1>, vector<8x16xf32>
    %71 = arith.addf %61, %70 : vector<8x16xf32>
    %72 = vector.extract_strided_slice %5 {offsets = [0, 4], sizes = [8, 1], strides = [1, 1]} : vector<8x8xi32> to vector<8x1xi32>
    %73 = vector.broadcast %72 : vector<8x1xi32> to vector<8x16xi32>
    %74 = vector.broadcast %30 : vector<1x16xi32> to vector<8x16xi32>
    %75 = arith.cmpi eq, %73, %74 : vector<8x16xi32>
    %76 = vector.extract_strided_slice %29 {offsets = [0, 4], sizes = [8, 1], strides = [1, 1]} : vector<8x8xf32> to vector<8x1xf32>
    %cst_23 = arith.constant 0.000000e+00 : f32
    %77 = vector.shape_cast %76 : vector<8x1xf32> to vector<8x1xf32>
    %78 = vector.broadcast %77 : vector<8x1xf32> to vector<8x16xf32>
    %79 = vector.broadcast %cst_23 : f32 to vector<8x16xf32>
    %80 = arith.select %75, %78, %79 : vector<8x16xi1>, vector<8x16xf32>
    %81 = arith.addf %71, %80 : vector<8x16xf32>
    %82 = vector.extract_strided_slice %5 {offsets = [0, 5], sizes = [8, 1], strides = [1, 1]} : vector<8x8xi32> to vector<8x1xi32>
    %83 = vector.broadcast %82 : vector<8x1xi32> to vector<8x16xi32>
    %84 = vector.broadcast %30 : vector<1x16xi32> to vector<8x16xi32>
    %85 = arith.cmpi eq, %83, %84 : vector<8x16xi32>
    %86 = vector.extract_strided_slice %29 {offsets = [0, 5], sizes = [8, 1], strides = [1, 1]} : vector<8x8xf32> to vector<8x1xf32>
    %cst_24 = arith.constant 0.000000e+00 : f32
    %87 = vector.shape_cast %86 : vector<8x1xf32> to vector<8x1xf32>
    %88 = vector.broadcast %87 : vector<8x1xf32> to vector<8x16xf32>
    %89 = vector.broadcast %cst_24 : f32 to vector<8x16xf32>
    %90 = arith.select %85, %88, %89 : vector<8x16xi1>, vector<8x16xf32>
    %91 = arith.addf %81, %90 : vector<8x16xf32>
    %92 = vector.extract_strided_slice %5 {offsets = [0, 6], sizes = [8, 1], strides = [1, 1]} : vector<8x8xi32> to vector<8x1xi32>
    %93 = vector.broadcast %92 : vector<8x1xi32> to vector<8x16xi32>
    %94 = vector.broadcast %30 : vector<1x16xi32> to vector<8x16xi32>
    %95 = arith.cmpi eq, %93, %94 : vector<8x16xi32>
    %96 = vector.extract_strided_slice %29 {offsets = [0, 6], sizes = [8, 1], strides = [1, 1]} : vector<8x8xf32> to vector<8x1xf32>
    %cst_25 = arith.constant 0.000000e+00 : f32
    %97 = vector.shape_cast %96 : vector<8x1xf32> to vector<8x1xf32>
    %98 = vector.broadcast %97 : vector<8x1xf32> to vector<8x16xf32>
    %99 = vector.broadcast %cst_25 : f32 to vector<8x16xf32>
    %100 = arith.select %95, %98, %99 : vector<8x16xi1>, vector<8x16xf32>
    %101 = arith.addf %91, %100 : vector<8x16xf32>
    %102 = vector.extract_strided_slice %5 {offsets = [0, 7], sizes = [8, 1], strides = [1, 1]} : vector<8x8xi32> to vector<8x1xi32>
    %103 = vector.broadcast %102 : vector<8x1xi32> to vector<8x16xi32>
    %104 = vector.broadcast %30 : vector<1x16xi32> to vector<8x16xi32>
    %105 = arith.cmpi eq, %103, %104 : vector<8x16xi32>
    %106 = vector.extract_strided_slice %29 {offsets = [0, 7], sizes = [8, 1], strides = [1, 1]} : vector<8x8xf32> to vector<8x1xf32>
    %cst_26 = arith.constant 0.000000e+00 : f32
    %107 = vector.shape_cast %106 : vector<8x1xf32> to vector<8x1xf32>
    %108 = vector.broadcast %107 : vector<8x1xf32> to vector<8x16xf32>
    %109 = vector.broadcast %cst_26 : f32 to vector<8x16xf32>
    %110 = arith.select %105, %108, %109 : vector<8x16xi1>, vector<8x16xf32>
    %111 = arith.addf %101, %110 : vector<8x16xf32>
    %cst_27 = arith.constant dense<0.000000e+00> : vector<8x128xf32>
    %112 = tpu.matmul %111, %8, %cst_27 {dimension_numbers = #tpu.dot_dimension_numbers<[1], [0], [0], [1], [0, 0, 1, 1], [], []>} : vector<8x16xf32>, vector<16x128xf32>, vector<8x128xf32> -> vector<8x128xf32>
    %113 = arith.addf %112, %1 : vector<8x128xf32>
    %c0_28 = arith.constant 0 : index
    %c0_29 = arith.constant 0 : index
    %c0_30 = arith.constant 0 : index
    %114 = vector.load %arg7[%c0_28, %c0_29, %c0_30] : memref<1x8x128xf32, #tpu.memory_space<vmem>>, vector<1x8x128xf32>
    %115 = vector.shape_cast %114 : vector<1x8x128xf32> to vector<8x128xf32>
    %116 = vector.shape_cast %113 : vector<8x128xf32> to vector<1x8x128xf32>
    tpu.vector_store %arg7[%c0_28, %c0_29, %c0_30], %116 {strides = array<i32>} : memref<1x8x128xf32, #tpu.memory_space<vmem>>, vector<1x8x128xf32>,
    return
  }
  func.func @transform_0(%arg0: i32, %arg1: i32) -> (i32, i32, i32) {
    %c0_i32 = arith.constant 0 : i32
    %c0_i32_0 = arith.constant 0 : i32
    return %arg0, %arg1, %c0_i32 : i32, i32, i32
  }
  func.func @transform_1(%arg0: i32, %arg1: i32) -> (i32, i32, i32) {
    %c0_i32 = arith.constant 0 : i32
    %c0_i32_0 = arith.constant 0 : i32
    %c0_i32_1 = arith.constant 0 : i32
    return %arg0, %c0_i32, %c0_i32_0 : i32, i32, i32
  }
  func.func @transform_2(%arg0: i32, %arg1: i32) -> (i32, i32, i32) {
    %c0_i32 = arith.constant 0 : i32
    %c0_i32_0 = arith.constant 0 : i32
    return %arg0, %arg1, %c0_i32 : i32, i32, i32
  }
  func.func @transform_3(%arg0: i32, %arg1: i32) -> (i32, i32, i32) {
    %c0_i32 = arith.constant 0 : i32
    %c0_i32_0 = arith.constant 0 : i32
    return %arg0, %arg1, %c0_i32 : i32, i32, i32
  }
  func.func @transform_4(%arg0: i32, %arg1: i32) -> (i32, i32) {
    %c0_i32 = arith.constant 0 : i32
    %c0_i32_0 = arith.constant 0 : i32
    %c0_i32_1 = arith.constant 0 : i32
    return %c0_i32, %c0_i32_0 : i32, i32
  }
  func.func @transform_5(%arg0: i32, %arg1: i32) -> (i32, i32, i32) {
    %c0_i32 = arith.constant 0 : i32
    %c0_i32_0 = arith.constant 0 : i32
    return %arg0, %arg1, %c0_i32 : i32, i32, i32
  }
}

module attributes {stable_mosaic.version = 11 : i64} {
  func.func @_kvmn_kernel(%arg0: i32, %arg1: i32, %arg2: memref<1x8x128xf32, #tpu.memory_space<vmem>>, %arg3: memref<1x8x128xf32, #tpu.memory_space<vmem>>, %arg4: memref<1x8x8xi32, #tpu.memory_space<vmem>>, %arg5: memref<1x8x8xi32, #tpu.memory_space<vmem>>, %arg6: memref<16x128xf32, #tpu.memory_space<vmem>>, %arg7: memref<1x8x128xf32, #tpu.memory_space<vmem>>) attributes {dimension_semantics = [#tpu.dimension_semantics<parallel>, #tpu.dimension_semantics<parallel>], iteration_bounds = array<i64: 2, 1>, scalar_prefetch = 0 : i64, scratch_operands = 0 : i64, tpu.core_type = #tpu.core_type<tc>, window_params = [{transform_indices = @transform_0, window_bounds = array<i64: 1, 8, 128>}, {transform_indices = @transform_1, window_bounds = array<i64: 1, 8, 128>}, {transform_indices = @transform_2, window_bounds = array<i64: 1, 8, 8>}, {transform_indices = @transform_3, window_bounds = array<i64: 1, 8, 8>}, {pipeline_mode = #tpu.pipeline_mode<synchronous>, transform_indices = @transform_4, window_bounds = array<i64: 16, 128>}, {transform_indices = @transform_5, window_bounds = array<i64: 1, 8, 128>}]} {
    %c0 = arith.constant 0 : index
    %c0_0 = arith.constant 0 : index
    %c0_1 = arith.constant 0 : index
    %0 = vector.load %arg2[%c0, %c0_0, %c0_1] : memref<1x8x128xf32, #tpu.memory_space<vmem>>, vector<1x8x128xf32>
    %1 = vector.shape_cast %0 : vector<1x8x128xf32> to vector<8x128xf32>
    %c0_2 = arith.constant 0 : index
    %c0_3 = arith.constant 0 : index
    %c0_4 = arith.constant 0 : index
    %2 = vector.load %arg3[%c0_2, %c0_3, %c0_4] : memref<1x8x128xf32, #tpu.memory_space<vmem>>, vector<1x8x128xf32>
    %3 = vector.shape_cast %2 : vector<1x8x128xf32> to vector<8x128xf32>
    %c0_5 = arith.constant 0 : index
    %c0_6 = arith.constant 0 : index
    %c0_7 = arith.constant 0 : index
    %4 = vector.load %arg4[%c0_5, %c0_6, %c0_7] : memref<1x8x8xi32, #tpu.memory_space<vmem>>, vector<1x8x8xi32>
    %5 = vector.shape_cast %4 : vector<1x8x8xi32> to vector<8x8xi32>
    %c0_8 = arith.constant 0 : index
    %c0_9 = arith.constant 0 : index
    %c0_10 = arith.constant 0 : index
    %6 = vector.load %arg5[%c0_8, %c0_9, %c0_10] : memref<1x8x8xi32, #tpu.memory_space<vmem>>, vector<1x8x8xi32>
    %7 = vector.shape_cast %6 : vector<1x8x8xi32> to vector<8x8xi32>
    %c0_11 = arith.constant 0 : index
    %c0_12 = arith.constant 0 : index
    %8 = vector.load %arg6[%c0_11, %c0_12] : memref<16x128xf32, #tpu.memory_space<vmem>>, vector<16x128xf32>
    %cst = arith.constant 0.176776692 : f32
    %9 = vector.broadcast %cst : f32 to vector<8x128xf32>
    %10 = arith.mulf %1, %9 : vector<8x128xf32>
    %cst_13 = arith.constant dense<0.000000e+00> : vector<8x8xf32>
    %11 = tpu.matmul %10, %3, %cst_13 {dimension_numbers = #tpu.dot_dimension_numbers<[1], [1], [0], [0], [0, 0, 1, 0], [], []>} : vector<8x128xf32>, vector<8x128xf32>, vector<8x8xf32> -> vector<8x8xf32>
    %c0_i32 = arith.constant 0 : i32
    %12 = vector.broadcast %c0_i32 : i32 to vector<8x8xi32>
    %13 = arith.cmpi sgt, %7, %12 : vector<8x8xi32>
    %14 = arith.extui %13 : vector<8x8xi1> to vector<8x8xi32>
    %15 = arith.sitofp %14 : vector<8x8xi32> to vector<8x8xf32>
    %cst_14 = arith.constant dense<0xFF800000> : vector<8xf32>
    %16 = vector.multi_reduction <maximumf>, %11, %cst_14 [1] : vector<8x8xf32> to vector<8xf32>
    %17 = vector.shape_cast %16 : vector<8xf32> to vector<8x1xf32>
    %18 = vector.broadcast %17 : vector<8x1xf32> to vector<8x8xf32>
    %19 = arith.subf %11, %18 : vector<8x8xf32>
    %20 = math.exp %19 : vector<8x8xf32>
    %21 = arith.mulf %20, %15 : vector<8x8xf32>
    %cst_15 = arith.constant dense<0.000000e+00> : vector<8xf32>
    %22 = vector.multi_reduction <add>, %21, %cst_15 [1] : vector<8x8xf32> to vector<8xf32>
    %23 = vector.shape_cast %22 : vector<8xf32> to vector<8x1xf32>
    %cst_16 = arith.constant 1.000000e-10 : f32
    %24 = vector.broadcast %cst_16 : f32 to vector<8x1xf32>
    %25 = arith.addf %23, %24 : vector<8x1xf32>
    %cst_17 = arith.constant 1.000000e+00 : f32
    %26 = vector.broadcast %cst_17 : f32 to vector<8x1xf32>
    %27 = arith.divf %26, %25 : vector<8x1xf32>
    %28 = vector.broadcast %27 : vector<8x1xf32> to vector<8x8xf32>
    %29 = arith.mulf %21, %28 : vector<8x8xf32>
    %30 = tpu.iota {dimensions = array<i32: 1>} : vector<1x16xi32>
    %cst_18 = arith.constant 0.000000e+00 : f32
    %31 = vector.broadcast %cst_18 : f32 to vector<8x16xf32>
    %32 = vector.extract_strided_slice %5 {offsets = [0, 0], sizes = [8, 1], strides = [1, 1]} : vector<8x8xi32> to vector<8x1xi32>
    %33 = vector.broadcast %32 : vector<8x1xi32> to vector<8x16xi32>
    %34 = vector.broadcast %30 : vector<1x16xi32> to vector<8x16xi32>
    %35 = arith.cmpi eq, %33, %34 : vector<8x16xi32>
    %36 = vector.extract_strided_slice %29 {offsets = [0, 0], sizes = [8, 1], strides = [1, 1]} : vector<8x8xf32> to vector<8x1xf32>
    %cst_19 = arith.constant 0.000000e+00 : f32
    %37 = vector.shape_cast %36 : vector<8x1xf32> to vector<8x1xf32>
    %38 = vector.broadcast %37 : vector<8x1xf32> to vector<8x16xf32>
    %39 = vector.broadcast %cst_19 : f32 to vector<8x16xf32>
    %40 = arith.select %35, %38, %39 : vector<8x16xi1>, vector<8x16xf32>
    %41 = arith.addf %31, %40 : vector<8x16xf32>
    %42 = vector.extract_strided_slice %5 {offsets = [0, 1], sizes = [8, 1], strides = [1, 1]} : vector<8x8xi32> to vector<8x1xi32>
    %43 = vector.broadcast %42 : vector<8x1xi32> to vector<8x16xi32>
    %44 = vector.broadcast %30 : vector<1x16xi32> to vector<8x16xi32>
    %45 = arith.cmpi eq, %43, %44 : vector<8x16xi32>
    %46 = vector.extract_strided_slice %29 {offsets = [0, 1], sizes = [8, 1], strides = [1, 1]} : vector<8x8xf32> to vector<8x1xf32>
    %cst_20 = arith.constant 0.000000e+00 : f32
    %47 = vector.shape_cast %46 : vector<8x1xf32> to vector<8x1xf32>
    %48 = vector.broadcast %47 : vector<8x1xf32> to vector<8x16xf32>
    %49 = vector.broadcast %cst_20 : f32 to vector<8x16xf32>
    %50 = arith.select %45, %48, %49 : vector<8x16xi1>, vector<8x16xf32>
    %51 = arith.addf %41, %50 : vector<8x16xf32>
    %52 = vector.extract_strided_slice %5 {offsets = [0, 2], sizes = [8, 1], strides = [1, 1]} : vector<8x8xi32> to vector<8x1xi32>
    %53 = vector.broadcast %52 : vector<8x1xi32> to vector<8x16xi32>
    %54 = vector.broadcast %30 : vector<1x16xi32> to vector<8x16xi32>
    %55 = arith.cmpi eq, %53, %54 : vector<8x16xi32>
    %56 = vector.extract_strided_slice %29 {offsets = [0, 2], sizes = [8, 1], strides = [1, 1]} : vector<8x8xf32> to vector<8x1xf32>
    %cst_21 = arith.constant 0.000000e+00 : f32
    %57 = vector.shape_cast %56 : vector<8x1xf32> to vector<8x1xf32>
    %58 = vector.broadcast %57 : vector<8x1xf32> to vector<8x16xf32>
    %59 = vector.broadcast %cst_21 : f32 to vector<8x16xf32>
    %60 = arith.select %55, %58, %59 : vector<8x16xi1>, vector<8x16xf32>
    %61 = arith.addf %51, %60 : vector<8x16xf32>
    %62 = vector.extract_strided_slice %5 {offsets = [0, 3], sizes = [8, 1], strides = [1, 1]} : vector<8x8xi32> to vector<8x1xi32>
    %63 = vector.broadcast %62 : vector<8x1xi32> to vector<8x16xi32>
    %64 = vector.broadcast %30 : vector<1x16xi32> to vector<8x16xi32>
    %65 = arith.cmpi eq, %63, %64 : vector<8x16xi32>
    %66 = vector.extract_strided_slice %29 {offsets = [0, 3], sizes = [8, 1], strides = [1, 1]} : vector<8x8xf32> to vector<8x1xf32>
    %cst_22 = arith.constant 0.000000e+00 : f32
    %67 = vector.shape_cast %66 : vector<8x1xf32> to vector<8x1xf32>
    %68 = vector.broadcast %67 : vector<8x1xf32> to vector<8x16xf32>
    %69 = vector.broadcast %cst_22 : f32 to vector<8x16xf32>
    %70 = arith.select %65, %68, %69 : vector<8x16xi1>, vector<8x16xf32>
    %71 = arith.addf %61, %70 : vector<8x16xf32>
    %72 = vector.extract_strided_slice %5 {offsets = [0, 4], sizes = [8, 1], strides = [1, 1]} : vector<8x8xi32> to vector<8x1xi32>
    %73 = vector.broadcast %72 : vector<8x1xi32> to vector<8x16xi32>
    %74 = vector.broadcast %30 : vector<1x16xi32> to vector<8x16xi32>
    %75 = arith.cmpi eq, %73, %74 : vector<8x16xi32>
    %76 = vector.extract_strided_slice %29 {offsets = [0, 4], sizes = [8, 1], strides = [1, 1]} : vector<8x8xf32> to vector<8x1xf32>
    %cst_23 = arith.constant 0.000000e+00 : f32
    %77 = vector.shape_cast %76 : vector<8x1xf32> to vector<8x1xf32>
    %78 = vector.broadcast %77 : vector<8x1xf32> to vector<8x16xf32>
    %79 = vector.broadcast %cst_23 : f32 to vector<8x16xf32>
    %80 = arith.select %75, %78, %79 : vector<8x16xi1>, vector<8x16xf32>
    %81 = arith.addf %71, %80 : vector<8x16xf32>
    %82 = vector.extract_strided_slice %5 {offsets = [0, 5], sizes = [8, 1], strides = [1, 1]} : vector<8x8xi32> to vector<8x1xi32>
    %83 = vector.broadcast %82 : vector<8x1xi32> to vector<8x16xi32>
    %84 = vector.broadcast %30 : vector<1x16xi32> to vector<8x16xi32>
    %85 = arith.cmpi eq, %83, %84 : vector<8x16xi32>
    %86 = vector.extract_strided_slice %29 {offsets = [0, 5], sizes = [8, 1], strides = [1, 1]} : vector<8x8xf32> to vector<8x1xf32>
    %cst_24 = arith.constant 0.000000e+00 : f32
    %87 = vector.shape_cast %86 : vector<8x1xf32> to vector<8x1xf32>
    %88 = vector.broadcast %87 : vector<8x1xf32> to vector<8x16xf32>
    %89 = vector.broadcast %cst_24 : f32 to vector<8x16xf32>
    %90 = arith.select %85, %88, %89 : vector<8x16xi1>, vector<8x16xf32>
    %91 = arith.addf %81, %90 : vector<8x16xf32>
    %92 = vector.extract_strided_slice %5 {offsets = [0, 6], sizes = [8, 1], strides = [1, 1]} : vector<8x8xi32> to vector<8x1xi32>
    %93 = vector.broadcast %92 : vector<8x1xi32> to vector<8x16xi32>
    %94 = vector.broadcast %30 : vector<1x16xi32> to vector<8x16xi32>
    %95 = arith.cmpi eq, %93, %94 : vector<8x16xi32>
    %96 = vector.extract_strided_slice %29 {offsets = [0, 6], sizes = [8, 1], strides = [1, 1]} : vector<8x8xf32> to vector<8x1xf32>
    %cst_25 = arith.constant 0.000000e+00 : f32
    %97 = vector.shape_cast %96 : vector<8x1xf32> to vector<8x1xf32>
    %98 = vector.broadcast %97 : vector<8x1xf32> to vector<8x16xf32>
    %99 = vector.broadcast %cst_25 : f32 to vector<8x16xf32>
    %100 = arith.select %95, %98, %99 : vector<8x16xi1>, vector<8x16xf32>
    %101 = arith.addf %91, %100 : vector<8x16xf32>
    %102 = vector.extract_strided_slice %5 {offsets = [0, 7], sizes = [8, 1], strides = [1, 1]} : vector<8x8xi32> to vector<8x1xi32>
    %103 = vector.broadcast %102 : vector<8x1xi32> to vector<8x16xi32>
    %104 = vector.broadcast %30 : vector<1x16xi32> to vector<8x16xi32>
    %105 = arith.cmpi eq, %103, %104 : vector<8x16xi32>
    %106 = vector.extract_strided_slice %29 {offsets = [0, 7], sizes = [8, 1], strides = [1, 1]} : vector<8x8xf32> to vector<8x1xf32>
    %cst_26 = arith.constant 0.000000e+00 : f32
    %107 = vector.shape_cast %106 : vector<8x1xf32> to vector<8x1xf32>
    %108 = vector.broadcast %107 : vector<8x1xf32> to vector<8x16xf32>
    %109 = vector.broadcast %cst_26 : f32 to vector<8x16xf32>
    %110 = arith.select %105, %108, %109 : vector<8x16xi1>, vector<8x16xf32>
    %111 = arith.addf %101, %110 : vector<8x16xf32>
    %cst_27 = arith.constant dense<0.000000e+00> : vector<8x128xf32>
    %112 = tpu.matmul %111, %8, %cst_27 {dimension_numbers = #tpu.dot_dimension_numbers<[1], [0], [0], [1], [0, 0, 1, 1], [], []>} : vector<8x16xf32>, vector<16x128xf32>, vector<8x128xf32> -> vector<8x128xf32>
    %113 = arith.addf %112, %1 : vector<8x128xf32>
    %c0_28 = arith.constant 0 : index
    %c0_29 = arith.constant 0 : index
    %c0_30 = arith.constant 0 : index
    %114 = vector.load %arg7[%c0_28, %c0_29, %c0_30] : memref<1x8x128xf32, #tpu.memory_space<vmem>>, vector<1x8x128xf32>
    %115 = vector.shape_cast %114 : vector<1x8x128xf32> to vector<8x128xf32>
    %116 = vector.shape_cast %113 : vector<8x128xf32> to vector<1x8x128xf32>
    tpu.vector_store %arg7[%c0_28, %c0_29, %c0_30], %116 {strides = array<i32>} : memref<1x8x128xf32, #tpu.memory_space<vmem>>, vector<1x8x128xf32>,
    return
  }
  func.func @transform_0(%arg0: i32, %arg1: i32) -> (i32, i32, i32) {
    %c0_i32 = arith.constant 0 : i32
    %c0_i32_0 = arith.constant 0 : i32
    return %arg0, %arg1, %c0_i32 : i32, i32, i32
  }
  func.func @transform_1(%arg0: i32, %arg1: i32) -> (i32, i32, i32) {
    %c0_i32 = arith.constant 0 : i32
    %c0_i32_0 = arith.constant 0 : i32
    %c0_i32_1 = arith.constant 0 : i32
    return %arg0, %c0_i32, %c0_i32_0 : i32, i32, i32
  }
  func.func @transform_2(%arg0: i32, %arg1: i32) -> (i32, i32, i32) {
    %c0_i32 = arith.constant 0 : i32
    %c0_i32_0 = arith.constant 0 : i32
    return %arg0, %arg1, %c0_i32 : i32, i32, i32
  }
  func.func @transform_3(%arg0: i32, %arg1: i32) -> (i32, i32, i32) {
    %c0_i32 = arith.constant 0 : i32
    %c0_i32_0 = arith.constant 0 : i32
    return %arg0, %arg1, %c0_i32 : i32, i32, i32
  }
  func.func @transform_4(%arg0: i32, %arg1: i32) -> (i32, i32) {
    %c0_i32 = arith.constant 0 : i32
    %c0_i32_0 = arith.constant 0 : i32
    %c0_i32_1 = arith.constant 0 : i32
    return %c0_i32, %c0_i32_0 : i32, i32
  }
  func.func @transform_5(%arg0: i32, %arg1: i32) -> (i32, i32, i32) {
    %c0_i32 = arith.constant 0 : i32
    %c0_i32_0 = arith.constant 0 : i32
    return %arg0, %arg1, %c0_i32 : i32, i32, i32
  }
}

</mosaic_0001>

<bundles_post_ra>
// kernel: tpu_custom_call.1
= control target key start
LH: loop header
LB: loop body
LE: loop exit
PB: predicated region body
PF: predicated region fallthrough
CT: control target
= control target key end

     0   :  { %s1569_s0 = inlined_call_operand.hbm [shape: f32[2,8,128], index: 0, kind: input, shape index: {}]   ;;  %s1570_s1 = inlined_call_operand.hbm [shape: f32[2,8,128], index: 1, kind: input, shape index: {}]   ;;  %s1571_s2 = inlined_call_operand.hbm [shape: s32[2,8,8], index: 2, kind: input, shape index: {}]   ;;  %s1572_s3 = inlined_call_operand.hbm [shape: s32[2,8,8], index: 3, kind: input, shape index: {}]   ;;  %s1573_s4 = inlined_call_operand.hbm [shape: f32[16,128], index: 4, kind: input, shape index: {}]   ;;  %s1574_s5 = inlined_call_operand.hbm [shape: f32[2,8,128], index: 5, kind: output, shape index: {}]  }
   0x1   :  { %1593 = sst [smem:[#allocation21_spill]] %s1569_s0 }
   0x2   :  { %10 = vsyncpa [#allocation3], 0 }
   0x3   :  { %12 = vsyncpa [#allocation3 + $0x1], 0 }
   0x4   :  { %13 = vsyncpa [#allocation6], 0 }
   0x5   :  { %14 = vsyncpa [#allocation4], 0 }
   0x6   :  { %16 = vsyncpa [#allocation4 + $0x1], 0  ;;  %s1235_s18 = smov 0   ;;  %s1237_s19 = smov 0  }
   0x7   :  { %s1239_s20 = smov 0   ;;  %s1241_s21 = smov 0  }
   0x8   :  { %s1243_s22 = smov 0   ;;  %s1245_s23 = smov 0  }
   0x9 LB: > { %1594 = sst [smem:[#allocation16_spill]] %s1172_s20  ;;  %s34_s24 = sadd.s32 1, %s1180_s22  ;;  %s1184_s23 = sphi %s1245_s23, %s22_s23   ;;  %s1180_s22 = sphi %s1243_s22, %s1626_s22   ;;  %s1176_s21 = sphi %s1241_s21, %s1625_s21   ;;  %s1172_s20 = sphi %s1239_s20, %s1624_s20   ;;  %s1168_s19 = sphi %s1237_s19, %s1628_s19   ;;  %s1164_s18 = sphi %s1235_s18, %s1627_s18  }
   0xa   : > { %1595 = sst [smem:[#allocation17_spill]] %s1180_s22  ;;  %s43_s25 = sadd.s32 1, %s1172_s20 }
   0xb   : > { %1596 = sst [smem:[#allocation18_spill]] %s1184_s23  ;;  %p36_p0 = scmp.ge.s32.totalorder %s34_s24, 2 }
   0xc   : > { %p1575_p1 = scmp.ne.s32.totalorder %s1172_s20, %s1168_s19  ;;  %p51_p2 = scmp.eq.s32.totalorder %s1184_s23, 0 }
   0xd   : > { %s1630_s24 = smov (%p36_p0, %s34_s24), 0  ;;  %p856_p5 = scmp.lt.s32.totalorder %s1184_s23, 2 }
   0xe   : > { %1597 = sst [smem:[#allocation19_spill]] %s1630_s24  ;;  %p52_p4 = por %p51_p2, %p1575_p1 }
   0xf   : > { %s38_s26 = ssub.s32 %s1180_s22, %s1630_s24  ;;  %s237_s27 = sand.u32 1, %s1184_s23  }
  0x10   : > { %p41_p6 = scmp.eq.s32.totalorder %s38_s26, 0  ;;  %s239_s28 = sand.u32 1, %s1172_s20  }
  0x11   : > { %s1282_s29 = sshll.u32 %s1180_s22, 7  ;;  %s1287_s6 = sshll.u32 %s239_s28, 3 }
  0x12   : > { %s1285_s30 = scalar_select %p41_p6, %s1172_s20, %s43_s25  }
  0x13   : > { %s1599_s0 = sld [smem:[#allocation21_spill]]  ;;  %p1295_p7 = pnand %p856_p5, %p52_p4 }
  0x14   : > { %1598 = sst [smem:[#allocation20_spill]] %s1285_s30  ;;  %s241_s11 = scalar_lea.vmem [#allocation2], %s1287_s6 }
  0x15   : > { %s1600_s10 = scalar_select %p1295_p7, 1, 0 }
  0x16   : > { %s249_s12 = sshll.u32 %s241_s11, 4  ;;  %s1302_s13 = scalar_lea.sflag [#allocation3], %s237_s27  ;;  %s1300_s12 = int_to_ptr.vmem [resolvable:$true] %s249_s12 }
  0x17   : > { %p1308_p9 = pneg %p1295_p7 }
  0x19   : > { %s1293_s9 = scalar_lea.hbm %s1599_s0, %s1282_s29  ;;  %s947_s25 = scalar_lea.hbm %s1599_s0, 256 }
  0x1a   : > { %s942_s14 = scalar_lea.hbm %s1293_s9, 128  ;;  %p948_p12 = scmp.lt.u32.totalorder %s1293_s9, %s1599_s0 }
  0x1b   : > { %p943_p8 = scmp.ne.s32.totalorder %s1293_s9, %s942_s14  ;;  %p949_p13 = scmp.lt.u32.totalorder %s947_s25, %s942_s14 }
  0x1c   : > { %s1601_s15 = scalar_select %p1308_p9, 1, 0 }
  0x1d   : > { %p945_p10 = pnand %p1308_p9, %p943_p8  ;;  %p950_p0 = por %p949_p13, %p948_p12 }
  0x1e   : > { %p951_p2 = scmp.lt.u32.totalorder %s942_s14, %s1293_s9 }
  0x1f   : > { %p946_p11 = pneg %p945_p10 }
  0x20   : > { %p952_p4 = por %p951_p2, %p950_p0 }
  0x22   : > { %p953_p5 = pnand %p952_p4, %p946_p11 }
  0x24   : > { %956 = shalt.err (!%p953_p5)
}
  0x25   : > { %s957_s27 = scalar_lea.vmem %s1300_s12, 128  ;;  %s1186_s7 = smov [#allocation2]  }
  0x26   : > { %p958_p6 = scmp.ne.s32.totalorder %s1300_s12, %s957_s27  ;;  %s962_s8 = sshll.u32 %s1186_s7, 4  ;;  %s963_s8 = int_to_ptr.vmem [resolvable:$false] %s962_s8 }
  0x27   : > { %s964_s11 = scalar_lea.vmem %s963_s8, 256  ;;  %p965_p3 = scmp.lt.s32.totalorder %s1300_s12, %s963_s8 }
  0x28   : > { %p960_p8 = pnand %p958_p6, %p1308_p9  ;;  %p966_p1 = scmp.lt.s32.totalorder %s964_s11, %s957_s27 }
  0x2a   : > { %p961_p10 = pneg %p960_p8  ;;  %p967_p12 = por %p966_p1, %p965_p3 }
  0x2c   : > { %p968_p13 = pnand %p967_p12, %p961_p10 }
  0x2e   : > { %971 = shalt.err (!%p968_p13)
}
  0x2f   : > { %844 = dma.hbm_to_vmem [thread:$0]  (!%p1295_p7), %s1293_s9, 128, %s1300_s12, %s1302_s13  }
  0x30   : > { %s1333_s14 = sadd.s32 4294967295, %s1184_s23   ;;  %s777_s16 = sadd.s32 4294967294, %s1184_s23  }
  0x31   : > { %p56_p1 = scmp.ne.s32.totalorder %s1168_s19, %s1164_s18  ;;  %p1582_p3 = scmp.eq.s32.totalorder %s1333_s14, 0 }
  0x32   : > { %p185_p11 = scmp.eq.s32.totalorder %s1333_s14, 1  ;;  %p191_p0 = scmp.eq.s32.totalorder %s777_s16, 1 }
  0x33   : > { %p778_p2 = scmp.ge.s32.totalorder %s1184_s23, 1  ;;  %p1343_p4 = por %p1582_p3, %p56_p1 }
  0x34   : > { %p1603_p5 = scmp.ne.s32.totalorder %s1172_s20, %s1168_s19  ;;  %p1354_p8 = por %p191_p0, %p56_p1 }
  0x35   : > { %s1602_s17 = scalar_select %p1343_p4, 1, 0 }
  0x36   : > { %p1350_p6 = por %p185_p11, %p1603_p5  ;;  %p198_p10 = scmp.lt.s32.totalorder %s1184_s23, 3 }
  0x37   : > { %s1605_s12 = scalar_select %p1354_p8, 1, 0 }
  0x38   : > { %s1604_s9 = scalar_select %p1350_p6, 1, 0 }
  0x39   : > { %s1577_s25 = sshll.u32 %s1176_s21, 7  ;;  %p1360_p12 = pnand %p778_p2, %p198_p10 }
  0x3a   : > { %s1369_s7 = scalar_lea.hbm %s1570_s1, %s1577_s25  ;;  %s1187_s8 = smov [#allocation5]  }
  0x3b   : > { %s1606_s26 = scalar_select %p1360_p12, 1, 0 }
  0x3c   : > { %s213_s11 = sshll.u32 %s1187_s8, 4  ;;  %p834_p13 = pneg %p1360_p12  ;;  %s214_s11 = int_to_ptr.vmem [resolvable:$true] %s213_s11 }
  0x3d   : > { %s1377_s24 = scalar_lea.hbm %s1571_s2, %s1282_s29  ;;  %s260_s8 = scalar_lea.vmem [#allocation7], %s1287_s6 }
  0x3e   : > { %p1381_p1 = pnand %p834_p13, %p1343_p4  ;;  %p1387_p11 = pnand %p834_p13, %p1582_p3 }
  0x3f   : > { %s268_s25 = sshll.u32 %s260_s8, 4  ;;  %s972_s22 = scalar_lea.hbm %s1369_s7, 128  ;;  %s1413_s25 = int_to_ptr.vmem [resolvable:$true] %s268_s25 }
  0x40   : > { %s1608_s27 = scalar_select %p1387_p11, 1, 0 }
  0x41   : > { %p973_p0 = scmp.ne.s32.totalorder %s1369_s7, %s972_s22  ;;  %p974_p2 = pneg %p1381_p1 }
  0x42   : > { %s977_s30 = scalar_lea.hbm %s1570_s1, 256  ;;  %p978_p13 = scmp.lt.u32.totalorder %s1369_s7, %s1570_s1 }
  0x43   : > { %p975_p5 = pnand %p974_p2, %p973_p0  ;;  %p979_p3 = scmp.lt.u32.totalorder %s977_s30, %s972_s22 }
  0x44   : > { %p981_p6 = scmp.lt.u32.totalorder %s972_s22, %s1369_s7 }
  0x45   : > { %p976_p10 = pneg %p975_p5  ;;  %p980_p8 = por %p979_p3, %p978_p13 }
  0x47   : > { %p982_p4 = por %p981_p6, %p980_p8 }
  0x49   : > { %p983_p12 = pnand %p982_p4, %p976_p10 }
  0x4b   : > { %986 = shalt.err (!%p983_p12)
}
  0x4c   : > { %s987_s8 = scalar_lea.vmem %s214_s11, 128  ;;  %p995_p7 = scmp.lt.s32.totalorder %s214_s11, %s214_s11 }
  0x4d   : > { %p988_p11 = scmp.ne.s32.totalorder %s214_s11, %s987_s8  ;;  %p996_p9 = scmp.lt.s32.totalorder %s987_s8, %s987_s8 }
  0x4f   : > { %p990_p0 = pnand %p988_p11, %p974_p2  ;;  %p997_p3 = por %p996_p9, %p995_p7 }
  0x51   : > { %p991_p5 = pneg %p990_p0 }
  0x53   : > { %p998_p13 = pnand %p997_p3, %p991_p5 }
  0x55   : > { %1001 = shalt.err (!%p998_p13)
}
  0x56   : > { %837 = dma.hbm_to_vmem [thread:$0]  (!%p1381_p1), %s1369_s7, 128, %s214_s11, [#allocation6]  }
  0x57   : > { %s1188_s20 = smov [#allocation9]   ;;  %s1002_s23 = scalar_lea.hbm %s1377_s24, 128 }
  0x58   : > { %s223_s22 = sshll.u32 %s1188_s20, 4  ;;  %p1003_p4 = scmp.ne.s32.totalorder %s1377_s24, %s1002_s23  ;;  %s224_s22 = int_to_ptr.vmem [resolvable:$true] %s223_s22 }
  0x59   : > { %p1609_p6 = scmp.ne.s32.totalorder %s1601_s15, 0  ;;  %s1007_s28 = scalar_lea.hbm %s1571_s2, 256 }
  0x5a   : > { %p1008_p9 = scmp.lt.u32.totalorder %s1377_s24, %s1571_s2  ;;  %p1009_p12 = scmp.lt.u32.totalorder %s1007_s28, %s1002_s23 }
  0x5b   : > { %p1005_p8 = pnand %p1003_p4, %p1609_p6  ;;  %p1011_p1 = scmp.lt.u32.totalorder %s1002_s23, %s1377_s24 }
  0x5c   : > { %p1010_p11 = por %p1009_p12, %p1008_p9 }
  0x5d   : > { %p1006_p7 = pneg %p1005_p8 }
  0x5e   : > { %p1012_p2 = por %p1011_p1, %p1010_p11 }
  0x60   : > { %p1013_p10 = pnand %p1012_p2, %p1006_p7 }
  0x62   : > { %1016 = shalt.err (!%p1013_p10)
}
  0x63   : > { %s1017_s7 = scalar_lea.vmem %s1413_s25, 128  ;;  %s1189_s11 = smov [#allocation7]  }
  0x64   : > { %p1018_p0 = scmp.ne.s32.totalorder %s1413_s25, %s1017_s7  ;;  %s1022_s20 = sshll.u32 %s1189_s11, 4  ;;  %s1023_s20 = int_to_ptr.vmem [resolvable:$false] %s1022_s20 }
  0x65   : > { %s1024_s30 = scalar_lea.vmem %s1023_s20, 256  ;;  %p1025_p13 = scmp.lt.s32.totalorder %s1413_s25, %s1023_s20 }
  0x66   : > { %p1020_p5 = pnand %p1018_p0, %p1609_p6  ;;  %p1026_p4 = scmp.lt.s32.totalorder %s1024_s30, %s1017_s7 }
  0x68   : > { %p1021_p3 = pneg %p1020_p5  ;;  %p1027_p8 = por %p1026_p4, %p1025_p13 }
  0x6a   : > { %p1028_p9 = pnand %p1027_p8, %p1021_p3 }
  0x6c   : > { %1031 = shalt.err (!%p1028_p9)
}
  0x6d   : > { %p1610_p7 = scmp.ne.s32.totalorder %s1600_s10, 0  ;;  %s1032_s28 = scalar_lea.hbm %s1573_s4, 256 }
  0x6e   : > { %p1033_p12 = scmp.ne.s32.totalorder %s1573_s4, %s1032_s28  ;;  %p1611_p11 = scmp.ne.s32.totalorder %s1608_s27, 0 }
  0x6f   : > { %847 = dma.hbm_to_vmem [thread:$0]  (!%p1610_p7), %s1377_s24, 128, %s1413_s25, %s1302_s13  }
  0x70   : > { %p1034_p1 = pneg %p1611_p11  ;;  %p1039_p0 = scmp.lt.u32.totalorder %s1032_s28, %s1573_s4 }
  0x72   : > { %p1035_p2 = pnand %p1034_p1, %p1033_p12 }
  0x74   : > { %p1036_p10 = pneg %p1035_p2 }
  0x76   : > { %p1041_p5 = pnand %p1039_p0, %p1036_p10 }
  0x78   : > { %1044 = shalt.err (!%p1041_p5)
}
  0x79   : > { %s1045_s24 = scalar_lea.vmem %s224_s22, 256  ;;  %p1053_p8 = scmp.lt.s32.totalorder %s224_s22, %s224_s22 }
  0x7a   : > { %p1046_p3 = scmp.ne.s32.totalorder %s224_s22, %s1045_s24  ;;  %p1054_p9 = scmp.lt.s32.totalorder %s1045_s24, %s1045_s24 }
  0x7c   : > { %p1048_p13 = pnand %p1046_p3, %p1034_p1  ;;  %p1055_p7 = por %p1054_p9, %p1053_p8 }
  0x7e   : > { %p1049_p4 = pneg %p1048_p13 }
  0x80   : > { %p1056_p6 = pnand %p1055_p7, %p1049_p4 }
  0x82   : > { %1059 = shalt.err (!%p1056_p6)
}
  0x83   : > { %s1190_s25 = smov 128   ;;  %s1191_s20 = smov 8  }
  0x84   : > { %840 = dma.hbm_to_vmem [thread:$0]  (!%p1611_p11), %s1573_s4, 256, %s224_s22, [#allocation6], %s1190_s25, %s1190_s25, %s1191_s20  }
  0x85   : > { %s1457_s16 = scalar_lea.hbm %s1572_s3, %s1282_s29  ;;  %s279_s8 = scalar_lea.vmem [#allocation8], %s1287_s6 }
  0x86   : > { %s287_s7 = sshll.u32 %s279_s8, 4  ;;  %s1060_s11 = scalar_lea.hbm %s1457_s16, 128  ;;  %s288_s7 = int_to_ptr.vmem [resolvable:$true] %s287_s7 }
  0x87   : > { %p1061_p6 = scmp.ne.s32.totalorder %s1457_s16, %s1060_s11  ;;  %p1612_p7 = scmp.ne.s32.totalorder %s1601_s15, 0 }
  0x88   : > { %s1065_s22 = scalar_lea.hbm %s1572_s3, 256  ;;  %p1066_p11 = scmp.lt.u32.totalorder %s1457_s16, %s1572_s3 }
  0x89   : > { %p1063_p12 = pnand %p1061_p6, %p1612_p7  ;;  %p1067_p2 = scmp.lt.u32.totalorder %s1065_s22, %s1060_s11 }
  0x8a   : > { %p1069_p0 = scmp.lt.u32.totalorder %s1060_s11, %s1457_s16 }
  0x8b   : > { %p1064_p1 = pneg %p1063_p12  ;;  %p1068_p10 = por %p1067_p2, %p1066_p11 }
  0x8d   : > { %p1070_p5 = por %p1069_p0, %p1068_p10 }
  0x8f   : > { %p1071_p3 = pnand %p1070_p5, %p1064_p1 }
  0x91   : > { %1074 = shalt.err (!%p1071_p3)
}
  0x92   : > { %s1075_s29 = scalar_lea.vmem %s288_s7, 128  ;;  %s1192_s6 = smov [#allocation8]  }
  0x93   : > { %p1076_p13 = scmp.ne.s32.totalorder %s288_s7, %s1075_s29  ;;  %s1080_s30 = sshll.u32 %s1192_s6, 4  ;;  %s1081_s30 = int_to_ptr.vmem [resolvable:$false] %s1080_s30 }
  0x94   : > { %s1082_s23 = scalar_lea.vmem %s1081_s30, 256  ;;  %p1083_p9 = scmp.lt.s32.totalorder %s288_s7, %s1081_s30 }
  0x95   : > { %p1078_p4 = pnand %p1076_p13, %p1612_p7  ;;  %p1084_p6 = scmp.lt.s32.totalorder %s1082_s23, %s1075_s29 }
  0x97   : > { %p1079_p8 = pneg %p1078_p4  ;;  %p1085_p12 = por %p1084_p6, %p1083_p9 }
  0x99   : > { %p1086_p2 = pnand %p1085_p12, %p1079_p8 }
  0x9b   : > { %1089 = shalt.err (!%p1086_p2)
}
  0x9c   : > { %p1613_p11 = scmp.ne.s32.totalorder %s1600_s10, 0  ;;  %p1614_p1 = scmp.ne.s32.totalorder %s1606_s26, 0 }
  0x9d   : > { %s298_s15 = sand.u32 (!%p1614_p1), 1, %s1333_s14   ;;  %s300_s0 = sand.u32 (!%p1614_p1), 1, %s1168_s19  }
  0x9e   : > { %850 = dma.hbm_to_vmem [thread:$0]  (!%p1613_p11), %s1457_s16, 128, %s288_s7, %s1302_s13  }
  0x9f   : > { %296 = sbr.rel (%p1614_p1) target bundleno = 1098 (0x44a), region = 40  ;;  %s1484_s28 = sshll.u32 (!%p1614_p1), %s300_s0, 3 }
  0xa0   : > { %s299_s8 = scalar_lea.sflag (!%p1614_p1), [#allocation3], %s298_s15  ;;  %s302_s11 = scalar_lea.vmem (!%p1614_p1), [#allocation2], %s1484_s28 }
  0xa1   : > { %p1615_p7 = scmp.ne.s32.totalorder (!%p1614_p1), %s1602_s17, 0 }
  0xa6   : > { %1143 = dma.done.wait (%p1615_p7), %s299_s8, 128  }
  0xa7   : > { %1145 = vsyncadd (%p1615_p7), %s299_s8, 4294967168 }
  0xa8   : > { %1147 = dma.done.wait (%p1615_p7), [#allocation6], 128  }
  0xa9   : > { %1149 = vsyncadd (%p1615_p7), [#allocation6], 4294967168  ;;  %s315_s10 = scalar_lea.vmem [#allocation7], %s1484_s28 }
  0xaa   : > { %1151 = dma.done.wait (%p1615_p7), %s299_s8, 256  }
  0xab   : > { %1153 = vsyncadd (%p1615_p7), %s299_s8, 4294967040  ;;  %s324_s13 = scalar_lea.vmem [#allocation8], %s1484_s28  ;;  %p1616_p10 = scmp.eq.s32.totalorder %s1333_s14, 0 }
  0xad   : > { %1155 = dma.done.wait (%p1616_p10), [#allocation6], 256   ;;  %p1617_p0 = pmov %p1616_p10 }
  0xae   : > { %v1193_v0 = vmov 0.0   ;;  %vm1194_vm0 = vmmov 0   ;;  %v366_v1 = vld [vmem:[#allocation5] sm:$0xff]  ;;  %v1505_v2 = vld [vmem:[%s302_s11] sm:$0xff]  ;;  %vm445_vm1 = vcmask 64512   ;;  %v367_v7 = vld [vmem:[%s315_s10] sm:$0xff]  ;;  %v460_v41 = vlaneseq }
  0xaf   : > { %1157 = vsyncadd (%p1617_p0), [#allocation6], 4294967040  ;;  %805 = vmatprep.subr.mxu0 %v1193_v0  ;;  %807 = vmatprep.mubr.msk.f32.mxu0 %vm1194_vm0, %v1193_v0  ;;  %v371_v3 = vmul.f32 0.17677669, %v1505_v2  ;;  %v1195_v8 = vmov 0   ;;  %v1196_v9 = vmov 1  }
  0xb0   : > { %814 = vmatprep.mubr.msk.f32.mxu1 %vm1194_vm0, %v1193_v0  ;;  %806 = vmatpush3.xpose.msra.mxu0 %v366_v1  ;;  %v1197_v10 = vmov 2   ;;  %v1198_v11 = vmov 3   ;;  %v1199_v12 = vmov 4   ;;  %v368_v16 = vld [vmem:[%s324_s13] sm:$0xff]  ;;  %v1200_v21 = vmov 5   ;;  %v369_v29 = vld [vmem:[#allocation9] sm:$0xff] }
  0xb1   : > { %922 = vset.pattern.permute.xlu1 %v1195_v8  ;;  %924 = vset.pattern.permute.xlu0 %v1195_v8  ;;  %vm442_vm2 = vcmp.gt.s32.totalorder %v368_v16, 0  ;;  %v1201_v22 = vmov 6   ;;  %v1202_v27 = vmov 7   ;;  %v1203_v28 = vmov 0.0|0.0   ;;  %v370_v30 = vld [vmem:[#allocation9 + $0x8] sm:$0xff]  ;;  %s364_s14 = scalar_lea.vmem [#allocation10], %s1484_s28 }
  0xb2   : > { %463 = vperm.xlu1 %922, %v367_v7   ;;  %v794_v17 = vsel %vm442_vm2, 1.0, %v1193_v0  ;;  %817 = vmatprep.subr.bf16.mxu1 %v1203_v28  ;;  %v818_v31 = vpack.c.bf16 %v370_v30, %v369_v29  ;;  %v461_v43 = vand.u32 127, %v460_v41  ;;  %vm543_vm11 = vcmask 130048   ;;  %s633_s17 = sshll.u32 %s364_s14, 4  ;;  %s1618_s26 = sshll.u32 %s1176_s21, 7  ;;  %s1521_s17 = int_to_ptr.vmem [resolvable:$true] %s633_s17 }
  0xb3   : > { %808 = vmatmul.mubr.f32.vlgmr.msra.gmra.mrb[0].mxu0 %v371_v3  ;;  %s1519_s27 = scalar_lea.hbm %s1574_s5, %s1618_s26  ;;  %s619_s24 = scalar_lea.sflag [#allocation4], %s300_s0 }
  0xb4   : > { %819 = vmatpush3.bf16.msra.mxu1 %v818_v31  ;;  %s1090_s22 = scalar_lea.vmem %s1521_s17, 128  ;;  %p1619_p3 = scmp.ne.s32.totalorder %s1604_s9, 0 }
  0xb5   : > { %p1091_p5 = scmp.ne.s32.totalorder %s1521_s17, %s1090_s22  ;;  %s1204_s25 = smov [#allocation10]  }
  0xb6   : > { %923 = vset.pattern.permute.xlu1 %v1196_v9  ;;  %s1094_s21 = sshll.u32 %s1204_s25, 4  ;;  %s1095_s21 = int_to_ptr.vmem [resolvable:$false] %s1094_s21 }
  0xb7   : > { %474 = vperm.xlu1 %923, %v367_v7   ;;  %p1092_p13 = pnand %p1091_p5, %p1619_p3  ;;  %s1096_s20 = scalar_lea.vmem %s1095_s21, 256 }
  0xb8   : > { %p1097_p8 = scmp.lt.s32.totalorder %s1521_s17, %s1095_s21  ;;  %p1098_p9 = scmp.lt.s32.totalorder %s1096_s20, %s1090_s22 }
  0xb9   : > { %p1093_p4 = pneg %p1092_p13 }
  0xba   : > { %p1099_p6 = por %p1098_p9, %p1097_p8 }
  0xbb   : > { %925 = vset.pattern.permute.xlu1 %v1197_v10 }
  0xbc   : > { %484 = vperm.xlu1 %925, %v367_v7   ;;  %p1100_p12 = pnand %p1099_p6, %p1093_p4 }
  0xc0   : > { %926 = vset.pattern.permute.xlu1 %v1198_v11 }
  0xc1   : > { %494 = vperm.xlu1 %926, %v367_v7  }
  0xc5   : > { %927 = vset.pattern.permute.xlu1 %v1199_v12 }
  0xc6   : > { %504 = vperm.xlu1 %927, %v367_v7  }
  0xca   : > { %928 = vset.pattern.permute.xlu1 %v1200_v21 }
  0xcb   : > { %514 = vperm.xlu1 %928, %v367_v7  }
  0xcf   : > { %929 = vset.pattern.permute.xlu1 %v1201_v22 }
  0xd0   : > { %524 = vperm.xlu1 %929, %v367_v7  }
  0xd4   : > { %930 = vset.pattern.permute.xlu1 %v1196_v9 }
 0x131   : > { %v464_v32 = vpop.permute.xlu1 %463 }
 0x132   : > { %vm465_vm3 = vcmp.eq.s32.totalorder %v464_v32, %v461_v43 }
 0x136   : > { %v475_v33 = vpop.permute.xlu1 %474 }
 0x137   : > { %vm476_vm4 = vcmp.eq.s32.totalorder %v475_v33, %v461_v43 }
 0x13b   : > { %v485_v34 = vpop.permute.xlu1 %484 }
 0x13c   : > { %vm486_vm5 = vcmp.eq.s32.totalorder %v485_v34, %v461_v43 }
 0x140   : > { %v495_v35 = vpop.permute.xlu1 %494 }
 0x141   : > { %vm496_vm6 = vcmp.eq.s32.totalorder %v495_v35, %v461_v43 }
 0x145   : > { %v505_v36 = vpop.permute.xlu1 %504 }
 0x146   : > { %vm506_vm7 = vcmp.eq.s32.totalorder %v505_v36, %v461_v43 }
 0x14a   : > { %v515_v37 = vpop.permute.xlu1 %514 }
 0x14b   : > { %vm516_vm8 = vcmp.eq.s32.totalorder %v515_v37, %v461_v43 }
 0x14f   : > { %v525_v38 = vpop.permute.xlu1 %524 }
 0x150   : > { %vm526_vm9 = vcmp.eq.s32.totalorder %v525_v38, %v461_v43 }
 0x186   : > { %v438_v4 = vpop.f32.mrb[0].mxu0 }
 0x187   : > { %v809_v5 = vpop.f32.mrb[1].mxu0  ;;  %v446_v6 = vsel %vm445_vm1, %v438_v4, -inf }
 0x188   : > { %447 = vmax.xlane.f32.xlu0 %v446_v6 }
 0x215   : > { %v448_v13 = vpop.xlane.xlu0 %447 }
 0x216   : > { %v449_v14 = vsub.f32 %v438_v4, %v448_v13 }
 0x218   : > { %v450_v15 = vmul.f32 1.442695, %v449_v14 }
 0x21a   : > { %938 = vpow2.f32 %v450_v15 }
 0x224   : > { %v939_v18 = vpop.eup %938 }
 0x225   : > { %v452_v19 = vmul.f32 %v939_v18, %v794_v17 }
 0x227   : > { %v453_v20 = vsel %vm445_vm1, %v452_v19, 0.0 }
 0x228   : > { %454 = vadd.xlane.f32.xlu0 %v453_v20 }
 0x2b5   : > { %v455_v23 = vpop.xlane.xlu0 %454 }
 0x2b6   : > { %v456_v24 = vadd.f32 1e-10, %v455_v23 }
 0x2b8   : > { %940 = vrcp.f32 %v456_v24 }
 0x2c2   : > { %v941_v25 = vpop.eup %940 }
 0x2c3   : > { %v459_v26 = vmul.f32 %v941_v25, %v452_v19 }
 0x2c5   : > { %478 = vperm.xlu1 %930, %v459_v26   ;;  %468 = vperm.xlu0 %924, %v459_v26  }
 0x2c9   : > { %931 = vset.pattern.permute.xlu1 %v1197_v10  ;;  %936 = vset.pattern.permute.xlu0 %v1202_v27 }
 0x2ca   : > { %488 = vperm.xlu1 %931, %v459_v26   ;;  %534 = vperm.xlu0 %936, %v367_v7  }
 0x2ce   : > { %932 = vset.pattern.permute.xlu1 %v1198_v11 }
 0x2cf   : > { %498 = vperm.xlu1 %932, %v459_v26  }
 0x2d3   : > { %933 = vset.pattern.permute.xlu1 %v1199_v12 }
 0x2d4   : > { %508 = vperm.xlu1 %933, %v459_v26  }
 0x2d8   : > { %934 = vset.pattern.permute.xlu1 %v1200_v21 }
 0x2d9   : > { %518 = vperm.xlu1 %934, %v459_v26  }
 0x2dd   : > { %935 = vset.pattern.permute.xlu1 %v1201_v22 }
 0x2de   : > { %528 = vperm.xlu1 %935, %v459_v26  }
 0x2e2   : > { %937 = vset.pattern.permute.xlu1 %v1202_v27 }
 0x2e3   : > { %538 = vperm.xlu1 %937, %v459_v26  }
 0x344   : > { %v479_v39 = vpop.permute.xlu1 %478  ;;  %v469_v44 = vpop.permute.xlu0 %468 }
 0x345   : > { %v481_v46 = vsel %vm476_vm4, %v479_v39, 0.0  ;;  %v471_v47 = vsel %vm465_vm3, %v469_v44, 0.0 }
 0x346   : > { %v482_v49 = vadd.f32 %v481_v46, %v471_v47 }
 0x349   : > { %v489_v40 = vpop.permute.xlu1 %488  ;;  %v535_v57 = vpop.permute.xlu0 %534 }
 0x34a   : > { %v491_v48 = vsel %vm486_vm5, %v489_v40, 0.0  ;;  %vm536_vm10 = vcmp.eq.s32.totalorder %v535_v57, %v461_v43 }
 0x34b   : > { %v492_v52 = vadd.f32 %v491_v48, %v482_v49 }
 0x34e   : > { %v499_v42 = vpop.permute.xlu1 %498 }
 0x34f   : > { %v501_v51 = vsel %vm496_vm6, %v499_v42, 0.0 }
 0x350   : > { %v502_v54 = vadd.f32 %v501_v51, %v492_v52 }
 0x353   : > { %v509_v45 = vpop.permute.xlu1 %508 }
 0x354   : > { %v511_v53 = vsel %vm506_vm7, %v509_v45, 0.0 }
 0x355   : > { %v512_v58 = vadd.f32 %v511_v53, %v502_v54 }
 0x358   : > { %v519_v50 = vpop.permute.xlu1 %518 }
 0x359   : > { %v521_v55 = vsel %vm516_vm8, %v519_v50, 0.0 }
 0x35a   : > { %v522_v60 = vadd.f32 %v521_v55, %v512_v58 }
 0x35d   : > { %v529_v56 = vpop.permute.xlu1 %528 }
 0x35e   : > { %v531_v59 = vsel %vm526_vm9, %v529_v56, 0.0 }
 0x35f   : > { %v532_v61 = vadd.f32 %v531_v59, %v522_v60 }
 0x362   : > { %v539_v62 = vpop.permute.xlu1 %538 }
 0x363   : > { %v541_v63 = vsel %vm536_vm10, %v539_v62, 0.0 }
 0x364   : > { %v542_v0 = vadd.f32 %v541_v63, %v532_v61 }
 0x366   : > { %815 = vmatmul.mubr.msk.f32.vlgmr.msra.gmra.mrb[0].mxu1 %vm543_vm11, %v542_v0 }
 0x439   : > { %v613_v1 = vpop.f32.mrb[0].mxu1 }
 0x43a   : > { %v614_v3 = vadd.f32 %v613_v1, %v1505_v2  ;;  %v816_v4 = vpop.f32.mrb[1].mxu1 }
 0x43c   : > { %617 = vst [vmem:[%s364_s14] sm:$0xff] %v614_v3 }
 0x43d   : > { %1103 = shalt.err (!%p1100_p12)
}
 0x43e   : > { %s1104_s29 = scalar_lea.hbm %s1519_s27, 128  ;;  %s1108_s23 = scalar_lea.hbm %s1574_s5, 256 }
 0x43f   : > { %p1105_p2 = scmp.ne.s32.totalorder %s1519_s27, %s1104_s29  ;;  %p1109_p7 = scmp.lt.u32.totalorder %s1519_s27, %s1574_s5 }
 0x440   : > { %p1110_p10 = scmp.lt.u32.totalorder %s1108_s23, %s1104_s29  ;;  %p1112_p5 = scmp.lt.u32.totalorder %s1104_s29, %s1519_s27 }
 0x441   : > { %p1106_p11 = pnand %p1105_p2, %p1619_p3 }
 0x442   : > { %p1111_p0 = por %p1110_p10, %p1109_p7 }
 0x443   : > { %p1107_p1 = pneg %p1106_p11 }
 0x444   : > { %p1113_p13 = por %p1112_p5, %p1111_p0 }
 0x446   : > { %p1114_p4 = pnand %p1113_p13, %p1107_p1 }
 0x448   : > { %1117 = shalt.err (!%p1114_p4)
}
 0x449   : > { %832 = dma.vmem_to_hbm [thread:$0]  (%p1619_p3), %s1521_s17, 128, %s1519_s27, %s619_s24  }
 0x44a PF: > { %s1620_s28 = sld [smem:[#allocation18_spill]]  ;;  %s645_s8 = sand.u32 1, %s1164_s18  }
 0x44b   : > { %p1621_p8 = scmp.ne.s32.totalorder %s1605_s12, 0  ;;  %s646_s11 = scalar_lea.sflag [#allocation4], %s645_s8 }
 0x450   : > { %p1622_p9 = scmp.ge.s32.totalorder %s1620_s28, 2 }
 0x452   : > { %p852_p6 = pnand %p1622_p9, %p1621_p8 }
 0x454   : > { %1159 = dma.done.wait (!%p852_p6), %s646_s11, 128  }
 0x455   : > { %1161 = vsyncadd (!%p852_p6), %s646_s11, 4294967168  ;;  %s22_s23 = sadd.s32 1, %s1620_s28   ;;  %s1623_s10 = sld [smem:[#allocation16_spill]] }
 0x456   : > { %p19_p12 = scmp.ge.s32.totalorder %s22_s23, 4   ;;  %s1624_s20 = sld [smem:[#allocation20_spill]] }
 0x457   : > { %s1625_s21 = sld [smem:[#allocation17_spill]]  ;;  %s1626_s22 = sld [smem:[#allocation19_spill]] }
 0x458   : > { %s1627_s18 = smov %s1168_s19  ;;  %21 = sbr.rel (!%p19_p12) target bundleno = 9 (0x9), region = 116 }
 0x45b   : > { %s1628_s19 = smov %s1623_s10 }
 0x45f   :  { %651 = vsyncpa [#allocation3], 1 }
 0x460   :  { %653 = vsyncpa [#allocation3 + $0x1], 1 }
 0x461   :  { %654 = vsyncpa [#allocation6], 1 }
 0x462   :  { %655 = vsyncpa [#allocation4], 1 }
 0x463   :  { %657 = vsyncpa [#allocation4 + $0x1], 1 }

// kernel: tpu_custom_call.1
= control target key start
LH: loop header
LB: loop body
LE: loop exit
PB: predicated region body
PF: predicated region fallthrough
CT: control target
= control target key end

     0   :  { %s1597_s0 = inlined_call_operand.hbm [shape: f32[2,8,128], index: 0, kind: input, shape index: {}]   ;;  %s1598_s1 = inlined_call_operand.hbm [shape: f32[2,8,128], index: 1, kind: input, shape index: {}]   ;;  %s1599_s2 = inlined_call_operand.hbm [shape: s32[2,8,8], index: 2, kind: input, shape index: {}]   ;;  %s1600_s3 = inlined_call_operand.hbm [shape: s32[2,8,8], index: 3, kind: input, shape index: {}]   ;;  %s1601_s4 = inlined_call_operand.hbm [shape: f32[16,128], index: 4, kind: input, shape index: {}]   ;;  %s1602_s5 = inlined_call_operand.hbm [shape: f32[2,8,128], index: 5, kind: output, shape index: {}]  }
   0x1   :  { %1615 = sst [smem:[#allocation22_spill]] %s1597_s0 }
   0x2   :  { %1616 = sst [smem:[#allocation23_spill]] %s1598_s1 }
   0x3   :  { %1617 = sst [smem:[#allocation24_spill]] %s1601_s4 }
   0x4   :  { %10 = vsyncpa [#allocation3], 0 }
   0x5   :  { %12 = vsyncpa [#allocation3 + $0x1], 0 }
   0x6   :  { %13 = vsyncpa [#allocation6], 0 }
   0x7   :  { %15 = vsyncpa [#allocation6 + $0x1], 0 }
   0x8   :  { %16 = vsyncpa [#allocation9], 0 }
   0x9   :  { %18 = vsyncpa [#allocation9 + $0x1], 0 }
   0xa   :  { %19 = vsyncpa [#allocation4], 0 }
   0xb   :  { %21 = vsyncpa [#allocation4 + $0x1], 0  ;;  %s1270_s18 = smov 0   ;;  %s1272_s19 = smov 0  }
   0xc   :  { %s1274_s20 = smov 0   ;;  %s1276_s21 = smov 0  }
   0xd   :  { %s1278_s22 = smov 0   ;;  %s1280_s23 = smov 0  }
   0xe LB: > { %1618 = sst [smem:[#allocation17_spill]] %s1207_s20  ;;  %s1301_s24 = sadd.s32 4294967295, %s1219_s23   ;;  %s1219_s23 = sphi %s1280_s23, %s27_s23   ;;  %s1215_s22 = sphi %s1278_s22, %s1649_s22   ;;  %s1211_s21 = sphi %s1276_s21, %s1648_s21   ;;  %s1207_s20 = sphi %s1274_s20, %s1647_s20   ;;  %s1203_s19 = sphi %s1272_s19, %s1651_s19   ;;  %s1199_s18 = sphi %s1270_s18, %s1650_s18  }
   0xf   : > { %1619 = sst [smem:[#allocation18_spill]] %s1215_s22  ;;  %s811_s25 = sadd.s32 4294967294, %s1219_s23  }
  0x10   : > { %p61_p0 = scmp.ne.s32.totalorder %s1203_s19, %s1199_s18  ;;  %p1603_p1 = scmp.eq.s32.totalorder %s1301_s24, 0 }
  0x11   : > { %p196_p3 = scmp.eq.s32.totalorder %s811_s25, 1  ;;  %p812_p5 = scmp.ge.s32.totalorder %s1219_s23, 1 }
  0x12   : > { %p1310_p4 = por %p1603_p1, %p61_p0  ;;  %p203_p7 = scmp.lt.s32.totalorder %s1219_s23, 3 }
  0x13   : > { %p1315_p6 = por %p196_p3, %p61_p0  ;;  %s1221_s29 = smov [#allocation10]  }
  0x14   : > { %s1620_s26 = scalar_select %p1310_p4, 1, 0 }
  0x15   : > { %s1621_s27 = scalar_select %p1315_p6, 1, 0 }
  0x16   : > { %p1320_p8 = pnand %p812_p5, %p203_p7  ;;  %s215_s30 = sshll.u32 %s1221_s29, 4  ;;  %s216_s30 = int_to_ptr.vmem [resolvable:$true] %s215_s30 }
  0x17   : > { %1622 = sst [smem:[#allocation19_spill]] %s1621_s27  ;;  %s39_s7 = sadd.s32 1, %s1215_s22 }
  0x18   : > { %s1623_s28 = scalar_select %p1320_p8, 1, 0 }
  0x19   : > { %p870_p9 = pneg %p1320_p8  ;;  %s1625_s4 = sld [smem:[#allocation24_spill]] }
  0x1b   : > { %p1329_p11 = pnand %p870_p9, %p1603_p1 }
  0x1d   : > { %p979_p13 = pneg %p1329_p11 }
  0x1f   : > { %s977_s10 = scalar_lea.hbm %s1625_s4, 256 }
  0x20   : > { %p978_p12 = scmp.ne.s32.totalorder %s1625_s4, %s977_s10  ;;  %p984_p5 = scmp.lt.u32.totalorder %s977_s10, %s1625_s4 }
  0x22   : > { %p980_p0 = pnand %p979_p13, %p978_p12 }
  0x24   : > { %p981_p3 = pneg %p980_p0 }
  0x26   : > { %p986_p7 = pnand %p984_p5, %p981_p3 }
  0x28   : > { %989 = shalt.err (!%p986_p7)
}
  0x29   : > { %s990_s15 = scalar_lea.vmem %s216_s30, 256  ;;  %p998_p2 = scmp.lt.s32.totalorder %s216_s30, %s216_s30 }
  0x2a   : > { %p991_p9 = scmp.ne.s32.totalorder %s216_s30, %s990_s15  ;;  %p999_p6 = scmp.lt.s32.totalorder %s990_s15, %s990_s15 }
  0x2c   : > { %p993_p10 = pnand %p991_p9, %p979_p13  ;;  %p1000_p4 = por %p999_p6, %p998_p2 }
  0x2e   : > { %p994_p1 = pneg %p993_p10 }
  0x30   : > { %p1001_p8 = pnand %p1000_p4, %p994_p1 }
  0x32   : > { %1004 = shalt.err (!%p1001_p8)
}
  0x33   : > { %s1222_s16 = smov 128   ;;  %s1223_s17 = smov 8  }
  0x34   : > { %873 = dma.hbm_to_vmem [thread:$0]  (!%p1329_p11), %s1625_s4, 256, %s216_s30, [#allocation9], %s1222_s16, %s1222_s16, %s1223_s17  }
  0x35   : > { %p41_p1 = scmp.ge.s32.totalorder %s39_s7, 2  ;;  %s48_s8 = sadd.s32 1, %s1207_s20 }
  0x36   : > { %p55_p2 = scmp.ne.s32.totalorder %s1207_s20, %s1203_s19  ;;  %p56_p4 = scmp.eq.s32.totalorder %s1219_s23, 0 }
  0x37   : > { %s1653_s7 = smov (%p41_p1, %s39_s7), 0  ;;  %p1627_p8 = scmp.eq.s32.totalorder %s1301_s24, 1 }
  0x38   : > { %1626 = sst [smem:[#allocation20_spill]] %s1653_s7  ;;  %p57_p6 = por %p56_p4, %p55_p2 }
  0x39   : > { %p1358_p10 = por %p1627_p8, %p55_p2  ;;  %s43_s6 = ssub.s32 %s1215_s22, %s1653_s7 }
  0x3a   : > { %p892_p12 = scmp.lt.s32.totalorder %s1219_s23, 2  ;;  %p46_p13 = scmp.eq.s32.totalorder %s43_s6, 0 }
  0x3b   : > { %s1628_s9 = scalar_select %p1358_p10, 1, 0 }
  0x3c   : > { %s1606_s10 = sand.u32 1, %s1207_s20   ;;  %s1371_s11 = sshll.u32 %s1215_s22, 7 }
  0x3d   : > { %s1368_s30 = sshll.u32 %s1606_s10, 3  ;;  %p1376_p11 = pnand %p892_p12, %p57_p6 }
  0x3e   : > { %s1374_s12 = scalar_select %p46_p13, %s1207_s20, %s48_s8  }
  0x3f   : > { %s1630_s13 = scalar_select %p1376_p11, 1, 0 }
  0x40   : > { %1629 = sst [smem:[#allocation21_spill]] %s1374_s12  ;;  %s1608_s14 = sand.u32 1, %s1219_s23  }
  0x41   : > { %s1631_s1 = sld [smem:[#allocation23_spill]]  ;;  %s252_s25 = scalar_lea.vmem [#allocation5], %s1368_s30 }
  0x42   : > { %s259_s29 = sshll.u32 %s252_s25, 4  ;;  %s1392_s8 = scalar_lea.sflag [#allocation6], %s1608_s14  ;;  %s1388_s29 = int_to_ptr.vmem [resolvable:$true] %s259_s29 }
  0x43   : > { %p1398_p3 = pneg %p1376_p11 }
  0x47   : > { %s1385_s17 = scalar_lea.hbm %s1631_s1, %s1371_s11  ;;  %s1010_s25 = scalar_lea.hbm %s1631_s1, 256 }
  0x48   : > { %s1005_s6 = scalar_lea.hbm %s1385_s17, 128  ;;  %p1011_p9 = scmp.lt.u32.totalorder %s1385_s17, %s1631_s1 }
  0x49   : > { %p1006_p0 = scmp.ne.s32.totalorder %s1385_s17, %s1005_s6  ;;  %p1012_p1 = scmp.lt.u32.totalorder %s1010_s25, %s1005_s6 }
  0x4a   : > { %p1014_p4 = scmp.lt.u32.totalorder %s1005_s6, %s1385_s17 }
  0x4b   : > { %p1008_p5 = pnand %p1398_p3, %p1006_p0  ;;  %p1013_p2 = por %p1012_p1, %p1011_p9 }
  0x4d   : > { %p1009_p7 = pneg %p1008_p5  ;;  %p1015_p6 = por %p1014_p4, %p1013_p2 }
  0x4f   : > { %p1016_p8 = pnand %p1015_p6, %p1009_p7 }
  0x51   : > { %1019 = shalt.err (!%p1016_p8)
}
  0x52   : > { %s1020_s14 = scalar_lea.vmem %s1388_s29, 128  ;;  %s1224_s15 = smov [#allocation5]  }
  0x53   : > { %p1021_p12 = scmp.ne.s32.totalorder %s1388_s29, %s1020_s14  ;;  %s1025_s16 = sshll.u32 %s1224_s15, 4  ;;  %s1026_s16 = int_to_ptr.vmem [resolvable:$false] %s1025_s16 }
  0x54   : > { %s1027_s4 = scalar_lea.vmem %s1026_s16, 256  ;;  %p1028_p5 = scmp.lt.s32.totalorder %s1388_s29, %s1026_s16 }
  0x55   : > { %p1023_p13 = pnand %p1021_p12, %p1398_p3  ;;  %p1029_p10 = scmp.lt.s32.totalorder %s1027_s4, %s1020_s14 }
  0x57   : > { %p1024_p0 = pneg %p1023_p13  ;;  %p1030_p9 = por %p1029_p10, %p1028_p5 }
  0x59   : > { %p1031_p1 = pnand %p1030_p9, %p1024_p0 }
  0x5b   : > { %1034 = shalt.err (!%p1031_p1)
}
  0x5c   : > { %880 = dma.hbm_to_vmem [thread:$0]  (!%p1376_p11), %s1385_s17, 128, %s1388_s29, %s1392_s8  }
  0x5d   : > { %s1633_s0 = sld [smem:[#allocation22_spill]]  ;;  %s233_s14 = scalar_lea.vmem [#allocation2], %s1368_s30 }
  0x5e   : > { %s241_s15 = sshll.u32 %s233_s14, 4  ;;  %s1435_s1 = scalar_lea.hbm %s1599_s2, %s1371_s11  ;;  %s1429_s15 = int_to_ptr.vmem [resolvable:$true] %s241_s15 }
  0x5f   : > { %s1634_s22 = sand.u32 1, %s1207_s20  }
  0x60   : > { %s230_s17 = scalar_lea.sflag [#allocation3], %s1634_s22 }
  0x63   : > { %s1426_s25 = scalar_lea.hbm %s1633_s0, %s1371_s11  ;;  %s1040_s12 = scalar_lea.hbm %s1633_s0, 256 }
  0x64   : > { %s1035_s29 = scalar_lea.hbm %s1426_s25, 128  ;;  %p1041_p4 = scmp.lt.u32.totalorder %s1426_s25, %s1633_s0 }
  0x65   : > { %p1036_p10 = scmp.ne.s32.totalorder %s1426_s25, %s1035_s29  ;;  %p1042_p6 = scmp.lt.u32.totalorder %s1040_s12, %s1035_s29 }
  0x66   : > { %p1044_p12 = scmp.lt.u32.totalorder %s1035_s29, %s1426_s25 }
  0x67   : > { %p1038_p7 = pnand %p1036_p10, %p1398_p3  ;;  %p1043_p8 = por %p1042_p6, %p1041_p4 }
  0x69   : > { %p1039_p2 = pneg %p1038_p7  ;;  %p1045_p13 = por %p1044_p12, %p1043_p8 }
  0x6b   : > { %p1046_p0 = pnand %p1045_p13, %p1039_p2 }
  0x6d   : > { %1049 = shalt.err (!%p1046_p0)
}
  0x6e   : > { %s1050_s22 = scalar_lea.vmem %s1429_s15, 128  ;;  %s1225_s16 = smov [#allocation2]  }
  0x6f   : > { %p1051_p5 = scmp.ne.s32.totalorder %s1429_s15, %s1050_s22  ;;  %s1055_s4 = sshll.u32 %s1225_s16, 4  ;;  %s1056_s4 = int_to_ptr.vmem [resolvable:$false] %s1055_s4 }
  0x70   : > { %s1057_s27 = scalar_lea.vmem %s1056_s4, 256  ;;  %p1058_p10 = scmp.lt.s32.totalorder %s1429_s15, %s1056_s4 }
  0x71   : > { %p1053_p9 = pnand %p1051_p5, %p1398_p3  ;;  %p1059_p7 = scmp.lt.s32.totalorder %s1057_s27, %s1050_s22 }
  0x73   : > { %p1054_p1 = pneg %p1053_p9  ;;  %p1060_p4 = por %p1059_p7, %p1058_p10 }
  0x75   : > { %p1061_p6 = pnand %p1060_p4, %p1054_p1 }
  0x77   : > { %1064 = shalt.err (!%p1061_p6)
}
  0x78   : > { %877 = dma.hbm_to_vmem [thread:$0]  (!%p1376_p11), %s1426_s25, 128, %s1429_s15, %s230_s17  }
  0x79   : > { %s270_s12 = scalar_lea.vmem [#allocation7], %s1368_s30  ;;  %s1465_s14 = scalar_lea.hbm %s1600_s3, %s1371_s11 }
  0x7a   : > { %s278_s29 = sshll.u32 %s270_s12, 4  ;;  %s1065_s22 = scalar_lea.hbm %s1435_s1, 128  ;;  %s279_s29 = int_to_ptr.vmem [resolvable:$true] %s278_s29 }
  0x7b   : > { %p1066_p2 = scmp.ne.s32.totalorder %s1435_s1, %s1065_s22  ;;  %s1070_s27 = scalar_lea.hbm %s1599_s2, 256 }
  0x7c   : > { %p1071_p13 = scmp.lt.u32.totalorder %s1435_s1, %s1599_s2  ;;  %p1072_p0 = scmp.lt.u32.totalorder %s1070_s27, %s1065_s22 }
  0x7d   : > { %p1068_p8 = pnand %p1066_p2, %p1398_p3  ;;  %p1074_p9 = scmp.lt.u32.totalorder %s1065_s22, %s1435_s1 }
  0x7e   : > { %p1073_p5 = por %p1072_p0, %p1071_p13 }
  0x7f   : > { %p1069_p12 = pneg %p1068_p8 }
  0x80   : > { %p1075_p1 = por %p1074_p9, %p1073_p5 }
  0x82   : > { %p1076_p10 = pnand %p1075_p1, %p1069_p12 }
  0x84   : > { %1079 = shalt.err (!%p1076_p10)
}
  0x85   : > { %s1080_s11 = scalar_lea.vmem %s279_s29, 128  ;;  %s1226_s25 = smov [#allocation7]  }
  0x86   : > { %p1081_p7 = scmp.ne.s32.totalorder %s279_s29, %s1080_s11  ;;  %s1085_s15 = sshll.u32 %s1226_s25, 4  ;;  %s1086_s15 = int_to_ptr.vmem [resolvable:$false] %s1085_s15 }
  0x87   : > { %s1087_s17 = scalar_lea.vmem %s1086_s15, 256  ;;  %p1088_p2 = scmp.lt.s32.totalorder %s279_s29, %s1086_s15 }
  0x88   : > { %p1083_p4 = pnand %p1081_p7, %p1398_p3  ;;  %p1089_p8 = scmp.lt.s32.totalorder %s1087_s17, %s1080_s11 }
  0x8a   : > { %p1084_p6 = pneg %p1083_p4  ;;  %p1090_p11 = por %p1089_p8, %p1088_p2 }
  0x8c   : > { %p1091_p0 = pnand %p1090_p11, %p1084_p6 }
  0x8e   : > { %1094 = shalt.err (!%p1091_p0)
}
  0x8f   : > { %p1635_p13 = scmp.ne.s32.totalorder %s1630_s13, 0  ;;  %s289_s0 = scalar_lea.vmem [#allocation8], %s1368_s30 }
  0x90   : > { %s297_s20 = sshll.u32 %s289_s0, 4  ;;  %s1636_s12 = sand.u32 1, %s1219_s23   ;;  %s298_s20 = int_to_ptr.vmem [resolvable:$true] %s297_s20 }
  0x91   : > { %883 = dma.hbm_to_vmem [thread:$0]  (!%p1635_p13), %s1435_s1, 128, %s279_s29, %s1392_s8  }
  0x92   : > { %s286_s7 = scalar_lea.sflag [#allocation9], %s1636_s12  ;;  %s1095_s6 = scalar_lea.hbm %s1465_s14, 128 }
  0x93   : > { %p1096_p11 = scmp.ne.s32.totalorder %s1465_s14, %s1095_s6  ;;  %s1100_s4 = scalar_lea.hbm %s1600_s3, 256 }
  0x94   : > { %p1101_p9 = scmp.lt.u32.totalorder %s1465_s14, %s1600_s3  ;;  %p1102_p1 = scmp.lt.u32.totalorder %s1100_s4, %s1095_s6 }
  0x95   : > { %p1098_p12 = pnand %p1096_p11, %p1398_p3  ;;  %p1104_p7 = scmp.lt.u32.totalorder %s1095_s6, %s1465_s14 }
  0x96   : > { %p1103_p10 = por %p1102_p1, %p1101_p9 }
  0x97   : > { %p1099_p5 = pneg %p1098_p12 }
  0x98   : > { %p1105_p4 = por %p1104_p7, %p1103_p10 }
  0x9a   : > { %p1106_p6 = pnand %p1105_p4, %p1099_p5 }
  0x9c   : > { %1109 = shalt.err (!%p1106_p6)
}
  0x9d   : > { %s1110_s1 = scalar_lea.vmem %s298_s20, 128  ;;  %s1227_s30 = smov [#allocation8]  }
  0x9e   : > { %p1111_p2 = scmp.ne.s32.totalorder %s298_s20, %s1110_s1  ;;  %s1115_s8 = sshll.u32 %s1227_s30, 4  ;;  %s1116_s8 = int_to_ptr.vmem [resolvable:$false] %s1115_s8 }
  0x9f   : > { %s1117_s29 = scalar_lea.vmem %s1116_s8, 256  ;;  %p1118_p11 = scmp.lt.s32.totalorder %s298_s20, %s1116_s8 }
  0xa0   : > { %p1113_p8 = pnand %p1111_p2, %p1398_p3  ;;  %p1119_p12 = scmp.lt.s32.totalorder %s1117_s29, %s1110_s1 }
  0xa2   : > { %p1114_p0 = pneg %p1113_p8  ;;  %p1120_p13 = por %p1119_p12, %p1118_p11 }
  0xa4   : > { %p1121_p1 = pnand %p1120_p13, %p1114_p0 }
  0xa6   : > { %1124 = shalt.err (!%p1121_p1)
}
  0xa7   : > { %p1637_p9 = scmp.ne.s32.totalorder %s1630_s13, 0  ;;  %p1638_p5 = scmp.ne.s32.totalorder %s1623_s28, 0 }
  0xa8   : > { %s1508_s10 = sand.u32 (!%p1638_p5), 1, %s1203_s19   ;;  %p1639_p3 = scmp.ne.s32.totalorder (!%p1638_p5), %s1620_s26, 0 }
  0xa9   : > { %886 = dma.hbm_to_vmem [thread:$0]  (!%p1637_p9), %s1465_s14, 128, %s298_s20, %s286_s7  }
  0xaa   : > { %306 = sbr.rel (%p1638_p5) target bundleno = 1111 (0x457), region = 40  ;;  %s1511_s25 = sshll.u32 (!%p1638_p5), %s1508_s10, 3 }
  0xab   : > { %s309_s15 = scalar_lea.sflag (!%p1638_p5), [#allocation3], %s1508_s10  ;;  %s312_s17 = scalar_lea.vmem (!%p1638_p5), [#allocation2], %s1511_s25 }
  0xb1   : > { %1178 = dma.done.wait (%p1639_p3), %s309_s15, 128  }
  0xb2   : > { %1180 = vsyncadd (%p1639_p3), %s309_s15, 4294967168  ;;  %s317_s28 = sand.u32 1, %s1301_s24   ;;  %s321_s14 = scalar_lea.vmem [#allocation5], %s1511_s25 }
  0xb3   : > { %s318_s13 = scalar_lea.sflag [#allocation6], %s317_s28 }
  0xb4   : > { %1182 = dma.done.wait (%p1639_p3), %s318_s13, 256  }
  0xb5   : > { %1184 = vsyncadd (%p1639_p3), %s318_s13, 4294967040  ;;  %s330_s0 = scalar_lea.vmem [#allocation7], %s1511_s25  ;;  %s336_s20 = scalar_lea.sflag [#allocation9], %s317_s28 }
  0xb6   : > { %s339_s12 = scalar_lea.vmem [#allocation8], %s1511_s25 }
  0xb7   : > { %1186 = dma.done.wait (%p1639_p3), %s336_s20, 128  }
  0xb8   : > { %1188 = vsyncadd (%p1639_p3), %s336_s20, 4294967168  ;;  %p1640_p13 = scmp.eq.s32.totalorder %s1301_s24, 0 }
  0xba   : > { %1190 = dma.done.wait (%p1640_p13), [#allocation9], 256   ;;  %p1641_p10 = pmov %p1640_p13 }
  0xbb   : > { %v1228_v0 = vmov 0.0   ;;  %vm1229_vm0 = vmmov 0   ;;  %v386_v1 = vld [vmem:[%s321_s14] sm:$0xff]  ;;  %v1535_v2 = vld [vmem:[%s312_s17] sm:$0xff]  ;;  %vm465_vm1 = vcmask 64512   ;;  %v1230_v8 = vmov 0  }
  0xbc   : > { %1192 = vsyncadd (%p1641_p10), [#allocation9], 4294967040  ;;  %841 = vmatprep.subr.mxu0 %v1228_v0  ;;  %843 = vmatprep.mubr.msk.f32.mxu0 %vm1229_vm0, %v1228_v0  ;;  %v391_v3 = vmul.f32 0.17677669, %v1535_v2  ;;  %v387_v7 = vld [vmem:[%s330_s0] sm:$0xff]  ;;  %v1231_v9 = vmov 1   ;;  %v480_v41 = vlaneseq }
  0xbd   : > { %850 = vmatprep.mubr.msk.f32.mxu1 %vm1229_vm0, %v1228_v0  ;;  %842 = vmatpush3.xpose.msra.mxu0 %v386_v1  ;;  %v1232_v10 = vmov 2   ;;  %v1233_v11 = vmov 3   ;;  %v1234_v12 = vmov 4   ;;  %v388_v16 = vld [vmem:[%s339_s12] sm:$0xff]  ;;  %v1235_v21 = vmov 5   ;;  %v389_v29 = vld [vmem:[#allocation10] sm:$0xff] }
  0xbe   : > { %957 = vset.pattern.permute.xlu1 %v1230_v8  ;;  %959 = vset.pattern.permute.xlu0 %v1230_v8  ;;  %vm462_vm2 = vcmp.gt.s32.totalorder %v388_v16, 0  ;;  %v1236_v22 = vmov 6   ;;  %v1237_v27 = vmov 7   ;;  %v1238_v28 = vmov 0.0|0.0   ;;  %v390_v30 = vld [vmem:[#allocation10 + $0x8] sm:$0xff]  ;;  %s833_s24 = sshll.u32 %s1211_s21, 7 }
  0xbf   : > { %483 = vperm.xlu1 %957, %v387_v7   ;;  %v830_v17 = vsel %vm462_vm2, 1.0, %v1228_v0  ;;  %853 = vmatprep.subr.bf16.mxu1 %v1238_v28  ;;  %v854_v31 = vpack.c.bf16 %v390_v30, %v389_v29  ;;  %v481_v43 = vand.u32 127, %v480_v41  ;;  %vm563_vm11 = vcmask 130048   ;;  %s384_s26 = scalar_lea.vmem [#allocation11], %s1511_s25  ;;  %s1548_s16 = scalar_lea.hbm %s1602_s5, %s833_s24 }
  0xc0   : > { %844 = vmatmul.mubr.f32.vlgmr.msra.gmra.mrb[0].mxu0 %v391_v3  ;;  %s653_s7 = sshll.u32 %s384_s26, 4  ;;  %s639_s4 = scalar_lea.sflag [#allocation4], %s1508_s10  ;;  %s1550_s7 = int_to_ptr.vmem [resolvable:$true] %s653_s7 }
  0xc1   : > { %855 = vmatpush3.bf16.msra.mxu1 %v854_v31  ;;  %s1125_s27 = scalar_lea.vmem %s1550_s7, 128  ;;  %p1642_p4 = scmp.ne.s32.totalorder %s1628_s9, 0 }
  0xc2   : > { %p1126_p7 = scmp.ne.s32.totalorder %s1550_s7, %s1125_s27  ;;  %s1239_s21 = smov [#allocation11]  }
  0xc3   : > { %958 = vset.pattern.permute.xlu1 %v1231_v9  ;;  %s1129_s11 = sshll.u32 %s1239_s21, 4  ;;  %s1130_s11 = int_to_ptr.vmem [resolvable:$false] %s1129_s11 }
  0xc4   : > { %494 = vperm.xlu1 %958, %v387_v7   ;;  %p1127_p6 = pnand %p1126_p7, %p1642_p4  ;;  %s1131_s1 = scalar_lea.vmem %s1130_s11, 256 }
  0xc5   : > { %p1132_p8 = scmp.lt.s32.totalorder %s1550_s7, %s1130_s11  ;;  %p1133_p0 = scmp.lt.s32.totalorder %s1131_s1, %s1125_s27 }
  0xc6   : > { %p1128_p2 = pneg %p1127_p6 }
  0xc7   : > { %p1134_p11 = por %p1133_p0, %p1132_p8 }
  0xc8   : > { %960 = vset.pattern.permute.xlu1 %v1232_v10 }
  0xc9   : > { %504 = vperm.xlu1 %960, %v387_v7   ;;  %p1135_p12 = pnand %p1134_p11, %p1128_p2 }
  0xcd   : > { %961 = vset.pattern.permute.xlu1 %v1233_v11 }
  0xce   : > { %514 = vperm.xlu1 %961, %v387_v7  }
  0xd2   : > { %962 = vset.pattern.permute.xlu1 %v1234_v12 }
  0xd3   : > { %524 = vperm.xlu1 %962, %v387_v7  }
  0xd7   : > { %963 = vset.pattern.permute.xlu1 %v1235_v21 }
  0xd8   : > { %534 = vperm.xlu1 %963, %v387_v7  }
  0xdc   : > { %964 = vset.pattern.permute.xlu1 %v1236_v22 }
  0xdd   : > { %544 = vperm.xlu1 %964, %v387_v7  }
  0xe1   : > { %965 = vset.pattern.permute.xlu1 %v1231_v9 }
 0x13e   : > { %v484_v32 = vpop.permute.xlu1 %483 }
 0x13f   : > { %vm485_vm3 = vcmp.eq.s32.totalorder %v484_v32, %v481_v43 }
 0x143   : > { %v495_v33 = vpop.permute.xlu1 %494 }
 0x144   : > { %vm496_vm4 = vcmp.eq.s32.totalorder %v495_v33, %v481_v43 }
 0x148   : > { %v505_v34 = vpop.permute.xlu1 %504 }
 0x149   : > { %vm506_vm5 = vcmp.eq.s32.totalorder %v505_v34, %v481_v43 }
 0x14d   : > { %v515_v35 = vpop.permute.xlu1 %514 }
 0x14e   : > { %vm516_vm6 = vcmp.eq.s32.totalorder %v515_v35, %v481_v43 }
 0x152   : > { %v525_v36 = vpop.permute.xlu1 %524 }
 0x153   : > { %vm526_vm7 = vcmp.eq.s32.totalorder %v525_v36, %v481_v43 }
 0x157   : > { %v535_v37 = vpop.permute.xlu1 %534 }
 0x158   : > { %vm536_vm8 = vcmp.eq.s32.totalorder %v535_v37, %v481_v43 }
 0x15c   : > { %v545_v38 = vpop.permute.xlu1 %544 }
 0x15d   : > { %vm546_vm9 = vcmp.eq.s32.totalorder %v545_v38, %v481_v43 }
 0x193   : > { %v458_v4 = vpop.f32.mrb[0].mxu0 }
 0x194   : > { %v845_v5 = vpop.f32.mrb[1].mxu0  ;;  %v466_v6 = vsel %vm465_vm1, %v458_v4, -inf }
 0x195   : > { %467 = vmax.xlane.f32.xlu0 %v466_v6 }
 0x222   : > { %v468_v13 = vpop.xlane.xlu0 %467 }
 0x223   : > { %v469_v14 = vsub.f32 %v458_v4, %v468_v13 }
 0x225   : > { %v470_v15 = vmul.f32 1.442695, %v469_v14 }
 0x227   : > { %973 = vpow2.f32 %v470_v15 }
 0x231   : > { %v974_v18 = vpop.eup %973 }
 0x232   : > { %v472_v19 = vmul.f32 %v974_v18, %v830_v17 }
 0x234   : > { %v473_v20 = vsel %vm465_vm1, %v472_v19, 0.0 }
 0x235   : > { %474 = vadd.xlane.f32.xlu0 %v473_v20 }
 0x2c2   : > { %v475_v23 = vpop.xlane.xlu0 %474 }
 0x2c3   : > { %v476_v24 = vadd.f32 1e-10, %v475_v23 }
 0x2c5   : > { %975 = vrcp.f32 %v476_v24 }
 0x2cf   : > { %v976_v25 = vpop.eup %975 }
 0x2d0   : > { %v479_v26 = vmul.f32 %v976_v25, %v472_v19 }
 0x2d2   : > { %498 = vperm.xlu1 %965, %v479_v26   ;;  %488 = vperm.xlu0 %959, %v479_v26  }
 0x2d6   : > { %966 = vset.pattern.permute.xlu1 %v1232_v10  ;;  %971 = vset.pattern.permute.xlu0 %v1237_v27 }
 0x2d7   : > { %508 = vperm.xlu1 %966, %v479_v26   ;;  %554 = vperm.xlu0 %971, %v387_v7  }
 0x2db   : > { %967 = vset.pattern.permute.xlu1 %v1233_v11 }
 0x2dc   : > { %518 = vperm.xlu1 %967, %v479_v26  }
 0x2e0   : > { %968 = vset.pattern.permute.xlu1 %v1234_v12 }
 0x2e1   : > { %528 = vperm.xlu1 %968, %v479_v26  }
 0x2e5   : > { %969 = vset.pattern.permute.xlu1 %v1235_v21 }
 0x2e6   : > { %538 = vperm.xlu1 %969, %v479_v26  }
 0x2ea   : > { %970 = vset.pattern.permute.xlu1 %v1236_v22 }
 0x2eb   : > { %548 = vperm.xlu1 %970, %v479_v26  }
 0x2ef   : > { %972 = vset.pattern.permute.xlu1 %v1237_v27 }
 0x2f0   : > { %558 = vperm.xlu1 %972, %v479_v26  }
 0x351   : > { %v499_v39 = vpop.permute.xlu1 %498  ;;  %v489_v44 = vpop.permute.xlu0 %488 }
 0x352   : > { %v501_v46 = vsel %vm496_vm4, %v499_v39, 0.0  ;;  %v491_v47 = vsel %vm485_vm3, %v489_v44, 0.0 }
 0x353   : > { %v502_v49 = vadd.f32 %v501_v46, %v491_v47 }
 0x356   : > { %v509_v40 = vpop.permute.xlu1 %508  ;;  %v555_v57 = vpop.permute.xlu0 %554 }
 0x357   : > { %v511_v48 = vsel %vm506_vm5, %v509_v40, 0.0  ;;  %vm556_vm10 = vcmp.eq.s32.totalorder %v555_v57, %v481_v43 }
 0x358   : > { %v512_v52 = vadd.f32 %v511_v48, %v502_v49 }
 0x35b   : > { %v519_v42 = vpop.permute.xlu1 %518 }
 0x35c   : > { %v521_v51 = vsel %vm516_vm6, %v519_v42, 0.0 }
 0x35d   : > { %v522_v54 = vadd.f32 %v521_v51, %v512_v52 }
 0x360   : > { %v529_v45 = vpop.permute.xlu1 %528 }
 0x361   : > { %v531_v53 = vsel %vm526_vm7, %v529_v45, 0.0 }
 0x362   : > { %v532_v58 = vadd.f32 %v531_v53, %v522_v54 }
 0x365   : > { %v539_v50 = vpop.permute.xlu1 %538 }
 0x366   : > { %v541_v55 = vsel %vm536_vm8, %v539_v50, 0.0 }
 0x367   : > { %v542_v60 = vadd.f32 %v541_v55, %v532_v58 }
 0x36a   : > { %v549_v56 = vpop.permute.xlu1 %548 }
 0x36b   : > { %v551_v59 = vsel %vm546_vm9, %v549_v56, 0.0 }
 0x36c   : > { %v552_v61 = vadd.f32 %v551_v59, %v542_v60 }
 0x36f   : > { %v559_v62 = vpop.permute.xlu1 %558 }
 0x370   : > { %v561_v63 = vsel %vm556_vm10, %v559_v62, 0.0 }
 0x371   : > { %v562_v0 = vadd.f32 %v561_v63, %v552_v61 }
 0x373   : > { %851 = vmatmul.mubr.msk.f32.vlgmr.msra.gmra.mrb[0].mxu1 %vm563_vm11, %v562_v0 }
 0x446   : > { %v633_v1 = vpop.f32.mrb[0].mxu1 }
 0x447   : > { %v634_v3 = vadd.f32 %v633_v1, %v1535_v2  ;;  %v852_v4 = vpop.f32.mrb[1].mxu1 }
 0x449   : > { %637 = vst [vmem:[%s384_s26] sm:$0xff] %v634_v3 }
 0x44a   : > { %1138 = shalt.err (!%p1135_p12)
}
 0x44b   : > { %s1139_s30 = scalar_lea.hbm %s1548_s16, 128  ;;  %s1143_s10 = scalar_lea.hbm %s1602_s5, 256 }
 0x44c   : > { %p1140_p1 = scmp.ne.s32.totalorder %s1548_s16, %s1139_s30  ;;  %p1144_p3 = scmp.lt.u32.totalorder %s1548_s16, %s1602_s5 }
 0x44d   : > { %p1145_p13 = scmp.lt.u32.totalorder %s1143_s10, %s1139_s30  ;;  %p1147_p7 = scmp.lt.u32.totalorder %s1139_s30, %s1548_s16 }
 0x44e   : > { %p1141_p9 = pnand %p1140_p1, %p1642_p4 }
 0x44f   : > { %p1146_p10 = por %p1145_p13, %p1144_p3 }
 0x450   : > { %p1142_p5 = pneg %p1141_p9 }
 0x451   : > { %p1148_p6 = por %p1147_p7, %p1146_p10 }
 0x453   : > { %p1149_p2 = pnand %p1148_p6, %p1142_p5 }
 0x455   : > { %1152 = shalt.err (!%p1149_p2)
}
 0x456   : > { %868 = dma.vmem_to_hbm [thread:$0]  (%p1642_p4), %s1550_s7, 128, %s1548_s16, %s639_s4  }
 0x457 PF: > { %s1643_s17 = sld [smem:[#allocation19_spill]]  ;;  %s665_s28 = sand.u32 1, %s1199_s18  }
 0x458   : > { %p1645_p0 = scmp.ge.s32.totalorder %s1219_s23, 2  ;;  %s666_s13 = scalar_lea.sflag [#allocation4], %s665_s28 }
 0x45d   : > { %p1644_p8 = scmp.ne.s32.totalorder %s1643_s17, 0 }
 0x45f   : > { %p888_p11 = pnand %p1645_p0, %p1644_p8 }
 0x461   : > { %1194 = dma.done.wait (!%p888_p11), %s666_s13, 128  }
 0x462   : > { %1196 = vsyncadd (!%p888_p11), %s666_s13, 4294967168  ;;  %s27_s23 = sadd.s32 1, %s1219_s23   ;;  %s1646_s14 = sld [smem:[#allocation17_spill]] }
 0x463   : > { %p24_p12 = scmp.ge.s32.totalorder %s27_s23, 4   ;;  %s1647_s20 = sld [smem:[#allocation21_spill]] }
 0x464   : > { %s1648_s21 = sld [smem:[#allocation18_spill]]  ;;  %s1649_s22 = sld [smem:[#allocation20_spill]] }
 0x465   : > { %s1650_s18 = smov %s1203_s19  ;;  %26 = sbr.rel (!%p24_p12) target bundleno = 14 (0xe), region = 126 }
 0x468   : > { %s1651_s19 = smov %s1646_s14 }
 0x46c   :  { %671 = vsyncpa [#allocation3], 1 }
 0x46d   :  { %673 = vsyncpa [#allocation3 + $0x1], 1 }
 0x46e   :  { %674 = vsyncpa [#allocation6], 1 }
 0x46f   :  { %676 = vsyncpa [#allocation6 + $0x1], 1 }
 0x470   :  { %677 = vsyncpa [#allocation9], 1 }
 0x471   :  { %679 = vsyncpa [#allocation9 + $0x1], 1 }
 0x472   :  { %680 = vsyncpa [#allocation4], 1 }
 0x473   :  { %682 = vsyncpa [#allocation4 + $0x1], 1 }

</bundles_post_ra>
